<compile_context>
chip_gen: v7x
topology: tpu7x:2x2x1
jax: 0.10.0
libtpu: 0.0.40
codegen_flags: <defaults>
</compile_context>

<pallas_src>
import math

import jax
import jax.numpy as jnp
from jax import lax
from jax.experimental import pallas as pl
from jax.experimental.pallas import tpu as pltpu


NEG_BIAS = -1e9      # finite (avoids -inf - -inf = NaN rows)


# ------------------------------ small utilities ------------------------------

def _round_up(x, m):
    return ((x + m - 1) // m) * m


_VMEM_LIMIT_CACHE = None


def _get_vmem_limit():
    """Per-generation VMEM budget with headroom (v7x 64MiB -> ~48MiB,
    v5e/v6e 128MiB -> ~102MiB)."""
    global _VMEM_LIMIT_CACHE
    if _VMEM_LIMIT_CACHE is None:
        try:
            cap = pltpu.get_tpu_info().vmem_capacity_bytes
        except Exception:
            cap = 128 * 1024 * 1024
        _VMEM_LIMIT_CACHE = int(min(cap - 16 * 1024 * 1024, int(cap * 0.80)))
    return _VMEM_LIMIT_CACHE


_SINGLE_BUFFER_CACHE = None


def _single_buffer_ok():
    """Probe once whether pipeline_mode=pl.Buffered(1) is supported."""
    global _SINGLE_BUFFER_CACHE
    if _SINGLE_BUFFER_CACHE is None:
        def _copy(x_ref, o_ref):
            o_ref[...] = x_ref[...]
        try:
            fn = pl.pallas_call(
                _copy,
                out_shape=jax.ShapeDtypeStruct((8, 128), jnp.float32),
                grid=(2,),
                in_specs=[pl.BlockSpec((8, 128), lambda i: (0, 0),
                                       pipeline_mode=pl.Buffered(1))],
                out_specs=pl.BlockSpec((8, 128), lambda i: (0, 0)))
            jax.block_until_ready(fn(jnp.zeros((8, 128), jnp.float32)))
            _SINGLE_BUFFER_CACHE = True
        except Exception:
            _SINGLE_BUFFER_CACHE = False
    return _SINGLE_BUFFER_CACHE


def _const_spec(shape):
    """BlockSpec for a grid-constant operand; single-buffered when possible."""
    zeros = (0,) * len(shape)
    if _single_buffer_ok():
        return pl.BlockSpec(shape, lambda *_: zeros,
                            pipeline_mode=pl.Buffered(1))
    return pl.BlockSpec(shape, lambda *_: zeros)


def _layernorm(x, g, b, eps):
    mu = jnp.mean(x, axis=-1, keepdims=True)
    var = jnp.mean((x - mu) ** 2, axis=-1, keepdims=True)
    return (x - mu) * lax.rsqrt(var + eps) * g + b


# --------------------------- fused transformer layer -------------------------

def _make_layer_kernel(seq_pad, tq, d_model, n_head, eps):
    hd = d_model // n_head
    scale = 1.0 / math.sqrt(hd)

    def kernel(x_ref, mask_ref,
               ln1_g, ln1_b, wqkv, bqkv, wo, bo,
               ln2_g, ln2_b, w1, b1, w2, b2,
               o_ref, q_sc, k_sc, v_sc):
        qi = pl.program_id(1)

        # ---- once per batch row: LN1 + fused QKV GEMM for the full sequence.
        @pl.when(qi == 0)
        def _():
            x_all = x_ref[...].astype(jnp.float32)                  # (S, D)
            h = _layernorm(x_all, ln1_g[...], ln1_b[...], eps)
            qkv = jnp.dot(h.astype(jnp.bfloat16), wqkv[...],
                          preferred_element_type=jnp.float32) + bqkv[...]
            q = (qkv[:, 0:d_model] * scale).reshape(seq_pad, n_head, hd)
            k = qkv[:, d_model:2 * d_model].reshape(seq_pad, n_head, hd)
            v = qkv[:, 2 * d_model:3 * d_model].reshape(seq_pad, n_head, hd)
            # head-major layouts stored once; q-tiles slice them with no
            # per-tile transpose.
            q_sc[...] = jnp.swapaxes(q, 0, 1).astype(jnp.bfloat16)  # (H,S,hd)
            k_sc[...] = jnp.swapaxes(k, 0, 1).astype(jnp.bfloat16)
            v_sc[...] = jnp.swapaxes(v, 0, 1).astype(jnp.bfloat16)

        # ---- per q-tile: attention + out-proj + residual + LN2 + MLP + res.
        r0 = pl.multiple_of(qi * tq, tq)
        x_t = x_ref[pl.ds(r0, tq), :].astype(jnp.float32)           # (Tq, D)
        q_t = q_sc[:, pl.ds(r0, tq), :]                             # (H,Tq,hd)

        # causal + padding key-mask for this query tile only (no (S,S) tensor)
        rows = lax.broadcasted_iota(jnp.int32, (tq, seq_pad), 0) + r0
        cols = lax.broadcasted_iota(jnp.int32, (tq, seq_pad), 1)
        causal = jnp.where(cols <= rows, 0.0, NEG_BIAS).astype(jnp.float32)
        pad = (1.0 - mask_ref[...].astype(jnp.float32)) * NEG_BIAS  # (1, S)
        bias = causal + pad                                         # (Tq, S)

        s = jnp.einsum('hqd,hkd->hqk', q_t, k_sc[...],
                       preferred_element_type=jnp.float32)          # (H,Tq,S)
        s = s + bias[None, :, :]
        m = jnp.max(s, axis=-1, keepdims=True)
        p = jnp.exp(s - m)
        denom = jnp.sum(p, axis=-1, keepdims=True)
        p = p * pl.reciprocal(denom, approx=True)
        o = jnp.einsum('hqk,hkd->hqd', p.astype(jnp.bfloat16), v_sc[...],
                       preferred_element_type=jnp.float32)          # (H,Tq,hd)
        attn = jnp.swapaxes(o, 0, 1).reshape(tq, d_model)           # (Tq, D)

        res1 = x_t + jnp.dot(attn.astype(jnp.bfloat16), wo[...],
                             preferred_element_type=jnp.float32) + bo[...]

        h2 = _layernorm(res1, ln2_g[...], ln2_b[...], eps)
        mlp = jnp.dot(h2.astype(jnp.bfloat16), w1[...],
                      preferred_element_type=jnp.float32) + b1[...]
        # TODO(synk): TransformerStack GELU variant unknown; tanh approx used.
        mlp = jax.nn.gelu(mlp, approximate=True)
        mlp = jnp.dot(mlp.astype(jnp.bfloat16), w2[...],
                      preferred_element_type=jnp.float32) + b2[...]

        o_ref[...] = (res1 + mlp).astype(o_ref.dtype)

    return kernel


def transformer_layer(x, attn_mask, layer, *, n_head, eps, tq):
    B, S_pad, D = x.shape
    hd = D // n_head
    (ln1_g, ln1_b, wqkv, bqkv, wo, bo,
     ln2_g, ln2_b, w1, b1, w2, b2) = layer
    kernel = _make_layer_kernel(S_pad, tq, D, n_head, eps)
    n_q = S_pad // tq

    return pl.pallas_call(
        kernel,
        out_shape=jax.ShapeDtypeStruct((B, S_pad, D), x.dtype),
        grid=(B, n_q),
        in_specs=[
            pl.BlockSpec((None, S_pad, D), lambda b, qi: (b, 0, 0)),  # x
            pl.BlockSpec((None, 1, S_pad), lambda b, qi: (b, 0, 0)),  # pad mask
            _const_spec(ln1_g.shape), _const_spec(ln1_b.shape),
            _const_spec(wqkv.shape), _const_spec(bqkv.shape),
            _const_spec(wo.shape), _const_spec(bo.shape),
            _const_spec(ln2_g.shape), _const_spec(ln2_b.shape),
            _const_spec(w1.shape), _const_spec(b1.shape),
            _const_spec(w2.shape), _const_spec(b2.shape),
        ],
        out_specs=pl.BlockSpec((None, tq, D), lambda b, qi: (b, qi, 0)),
        scratch_shapes=[
            pltpu.VMEM((n_head, S_pad, hd), jnp.bfloat16),   # q (scaled)
            pltpu.VMEM((n_head, S_pad, hd), jnp.bfloat16),   # k
            pltpu.VMEM((n_head, S_pad, hd), jnp.bfloat16),   # v
        ],
        compiler_params=pltpu.CompilerParams(
            dimension_semantics=("parallel", "arbitrary"),
            vmem_limit_bytes=_get_vmem_limit()),
    )(x, attn_mask, ln1_g, ln1_b, wqkv, bqkv, wo, bo,
      ln2_g, ln2_b, w1, b1, w2, b2)


# ------------------------- final LN + tied lm_head ----------------------------

def _make_head_kernel(eps):
    def kernel(x_ref, g_ref, b_ref, w_ref, o_ref, h_sc):
        # final LayerNorm computed ONCE per batch row (not per vocab tile)
        @pl.when(pl.program_id(1) == 0)
        def _():
            h = _layernorm(x_ref[...].astype(jnp.float32),
                           g_ref[...], b_ref[...], eps)
            h_sc[...] = h.astype(jnp.bfloat16)
        # w_ref: (tv, D) tied-embedding rows; contract on D (no pre-transpose)
        logits = lax.dot_general(
            h_sc[...], w_ref[...],
            (((1,), (1,)), ((), ())),
            preferred_element_type=jnp.float32)                  # (S, tv)
        o_ref[...] = logits.astype(o_ref.dtype)
    return kernel


def final_ln_and_lm_head(x, lnf_g, lnf_b, w_vd, *, eps, tv):
    """w_vd: (Vp, D) tied embedding (bf16). Vocab-tiled, lane-dense GEMM."""
    B, S_pad, D = x.shape
    Vp = w_vd.shape[0]
    kernel = _make_head_kernel(eps)
    return pl.pallas_call(
        kernel,
        out_shape=jax.ShapeDtypeStruct((B, S_pad, Vp), jnp.float32),
        grid=(B, Vp // tv),
        in_specs=[
            pl.BlockSpec((None, S_pad, D), lambda b, vi: (b, 0, 0)),
            _const_spec(lnf_g.shape), _const_spec(lnf_b.shape),
            # streamed vocab tiles -> keep default double-buffering for overlap
            pl.BlockSpec((tv, D), lambda b, vi: (vi, 0)),
        ],
        out_specs=pl.BlockSpec((None, S_pad, tv), lambda b, vi: (b, 0, vi)),
        scratch_shapes=[pltpu.VMEM((S_pad, D), jnp.bfloat16)],
        compiler_params=pltpu.CompilerParams(
            dimension_semantics=("parallel", "arbitrary"),
            vmem_limit_bytes=_get_vmem_limit()),
    )(x, lnf_g, lnf_b, w_vd)


# ----------------------------- parameter init --------------------------------

def _head_tiles(vocab_size):
    tv = 2048 if vocab_size >= 2048 else _round_up(vocab_size, 128)
    v_pad = _round_up(vocab_size, tv)
    return tv, v_pad


def init_params(key, *, vocab_size, d_model, n_layer, n_head, max_seq_len,
                mlp_ratio=4.0):
    std = 0.02
    hidden = int(mlp_ratio * d_model)
    keys = list(jax.random.split(key, 2 + 4 * n_layer))

    def normal(k, shape):
        return (std * jax.random.normal(k, shape)).astype(jnp.float32)

    tok_emb = normal(keys[0], (vocab_size, d_model))
    tv, v_pad = _head_tiles(vocab_size)
    lm_head_w = jnp.pad(tok_emb, ((0, v_pad - vocab_size), (0, 0)))

    params = {
        "vocab_size": vocab_size,
        "head_tv": tv,
        "tok_emb": tok_emb,                                   # f32, for gather
        "lm_head_w": lm_head_w.astype(jnp.bfloat16),          # tied, pre-cast
        "pos_emb": normal(keys[1], (max_seq_len, d_model)),
        "lnf_g": jnp.ones((1, d_model), jnp.float32),
        "lnf_b": jnp.zeros((1, d_model), jnp.float32),
        "layers": [],
    }
    ki = 2
    for _ in range(n_layer):
        wqkv = normal(keys[ki + 0], (d_model, 3 * d_model)).astype(jnp.bfloat16)
        wo = normal(keys[ki + 1], (d_model, d_model)).astype(jnp.bfloat16)
        w1 = normal(keys[ki + 2], (d_model, hidden)).astype(jnp.bfloat16)
        w2 = normal(keys[ki + 3], (hidden, d_model)).astype(jnp.bfloat16)
        ki += 4
        layer = (
            jnp.ones((1, d_model), jnp.float32),        # ln1 gamma
            jnp.zeros((1, d_model), jnp.float32),       # ln1 beta
            wqkv,
            jnp.zeros((1, 3 * d_model), jnp.float32),   # qkv bias
            wo,
            jnp.zeros((1, d_model), jnp.float32),       # out-proj bias
            jnp.ones((1, d_model), jnp.float32),        # ln2 gamma
            jnp.zeros((1, d_model), jnp.float32),       # ln2 beta
            w1,
            jnp.zeros((1, hidden), jnp.float32),        # mlp fc1 bias
            w2,
            jnp.zeros((1, d_model), jnp.float32),       # mlp fc2 bias
        )
        params["layers"].append(layer)
    return params


# ------------------------------- forward pass ---------------------------------

def sales_gpt_forward(input_ids, params, *, n_head, eps=1e-5,
                      attention_mask=None):
    B, S = input_ids.shape

    if attention_mask is None:
        attention_mask = jnp.ones((B, S), jnp.float32)
    attention_mask = attention_mask.astype(jnp.float32)

    # seq padded to a multiple of the q-tile so all blocks stay (8,128)-aligned
    s8 = _round_up(S, 8)
    tq = min(256, s8)
    s_pad = _round_up(s8, tq)

    # glue: embedding gather (Pallas has no clean dynamic-gather here)
    tok = params["tok_emb"][input_ids]                       # (B, S, D)
    pos = params["pos_emb"][jnp.arange(S)][None, :, :]       # (1, S, D)
    x = (tok + pos).astype(jnp.float32)
    if s_pad != S:
        x = jnp.pad(x, ((0, 0), (0, s_pad - S), (0, 0)))
        attention_mask = jnp.pad(attention_mask, ((0, 0), (0, s_pad - S)))
    attn_mask = attention_mask.reshape(B, 1, s_pad)

    for layer in params["layers"]:
        x = transformer_layer(x, attn_mask, layer, n_head=n_head, eps=eps,
                              tq=tq)

    logits = final_ln_and_lm_head(
        x, params["lnf_g"], params["lnf_b"], params["lm_head_w"],
        eps=eps, tv=params["head_tv"])
    return logits[:, :S, :params["vocab_size"]]


# TODO(synk): generate() (top-k/top-p sampling loop), the optional value head,
#             and dropout (training mode) are not part of the validated hot
#             path here.

# ----------------------------------- main -------------------------------------

if __name__ == "__main__":
    VOCAB = 256
    D_MODEL = 128
    N_LAYER = 2
    N_HEAD = 4
    MAX_SEQ = 64
    BATCH = 2
    SEQ = 8

    key = jax.random.PRNGKey(0)
    pkey, ikey = jax.random.split(key)
    params = init_params(pkey, vocab_size=VOCAB, d_model=D_MODEL,
                         n_layer=N_LAYER, n_head=N_HEAD, max_seq_len=MAX_SEQ)

    input_ids = jax.random.randint(ikey, (BATCH, SEQ), 0, VOCAB, dtype=jnp.int32)

    logits = sales_gpt_forward(input_ids, params, n_head=N_HEAD)
    logits = jax.block_until_ready(logits)

    assert logits.shape == (BATCH, SEQ, VOCAB), logits.shape
    assert jnp.all(jnp.isfinite(logits))
    print("KERNEL_OK")
</pallas_src>

<mosaic_0001>
module attributes {stable_mosaic.version = 11 : i64} {
  func.func @_copy(%arg0: i32, %arg1: memref<8x128xf32, #tpu.memory_space<vmem>>, %arg2: memref<8x128xf32, #tpu.memory_space<vmem>>) attributes {dimension_semantics = [#tpu.dimension_semantics<arbitrary>], iteration_bounds = array<i64: 2>, scalar_prefetch = 0 : i64, scratch_operands = 0 : i64, tpu.core_type = #tpu.core_type<tc>, window_params = [{pipeline_mode = #tpu.pipeline_mode<synchronous>, transform_indices = @transform_0, window_bounds = array<i64: 8, 128>}, {pipeline_mode = #tpu.pipeline_mode<synchronous>, transform_indices = @transform_1, window_bounds = array<i64: 8, 128>}]} {
    %c0 = arith.constant 0 : index
    %c0_0 = arith.constant 0 : index
    %0 = vector.load %arg1[%c0, %c0_0] : memref<8x128xf32, #tpu.memory_space<vmem>>, vector<8x128xf32>
    %c0_1 = arith.constant 0 : index
    %c0_2 = arith.constant 0 : index
    %1 = vector.load %arg2[%c0_1, %c0_2] : memref<8x128xf32, #tpu.memory_space<vmem>>, vector<8x128xf32>
    tpu.vector_store %arg2[%c0_1, %c0_2], %0 {strides = array<i32>} : memref<8x128xf32, #tpu.memory_space<vmem>>, vector<8x128xf32>,
    return
  }
  func.func @transform_0(%arg0: i32) -> (i32, i32) {
    %c0_i32 = arith.constant 0 : i32
    %c0_i32_0 = arith.constant 0 : i32
    %c0_i32_1 = arith.constant 0 : i32
    return %c0_i32, %c0_i32_0 : i32, i32
  }
  func.func @transform_1(%arg0: i32) -> (i32, i32) {
    %c0_i32 = arith.constant 0 : i32
    %c0_i32_0 = arith.constant 0 : i32
    %c0_i32_1 = arith.constant 0 : i32
    return %c0_i32, %c0_i32_0 : i32, i32
  }
}

module attributes {stable_mosaic.version = 11 : i64} {
  func.func @kernel(%arg0: i32, %arg1: i32, %arg2: memref<1x8x128xf32, #tpu.memory_space<vmem>>, %arg3: memref<1x1x8xf32, #tpu.memory_space<vmem>>, %arg4: memref<1x128xf32, #tpu.memory_space<vmem>>, %arg5: memref<1x128xf32, #tpu.memory_space<vmem>>, %arg6: memref<128x384xbf16, #tpu.memory_space<vmem>>, %arg7: memref<1x384xf32, #tpu.memory_space<vmem>>, %arg8: memref<128x128xbf16, #tpu.memory_space<vmem>>, %arg9: memref<1x128xf32, #tpu.memory_space<vmem>>, %arg10: memref<1x128xf32, #tpu.memory_space<vmem>>, %arg11: memref<1x128xf32, #tpu.memory_space<vmem>>, %arg12: memref<128x512xbf16, #tpu.memory_space<vmem>>, %arg13: memref<1x512xf32, #tpu.memory_space<vmem>>, %arg14: memref<512x128xbf16, #tpu.memory_space<vmem>>, %arg15: memref<1x128xf32, #tpu.memory_space<vmem>>, %arg16: memref<1x8x128xf32, #tpu.memory_space<vmem>>, %arg17: memref<4x8x32xbf16, #tpu.memory_space<vmem>>, %arg18: memref<4x8x32xbf16, #tpu.memory_space<vmem>>, %arg19: memref<4x8x32xbf16, #tpu.memory_space<vmem>>) attributes {dimension_semantics = [#tpu.dimension_semantics<parallel>, #tpu.dimension_semantics<arbitrary>], iteration_bounds = array<i64: 2, 1>, scalar_prefetch = 0 : i64, scratch_operands = 3 : i64, tpu.core_type = #tpu.core_type<tc>, window_params = [{transform_indices = @transform_0, window_bounds = array<i64: 1, 8, 128>}, {transform_indices = @transform_1, window_bounds = array<i64: 1, 1, 8>}, {pipeline_mode = #tpu.pipeline_mode<synchronous>, transform_indices = @transform_2, window_bounds = array<i64: 1, 128>}, {pipeline_mode = #tpu.pipeline_mode<synchronous>, transform_indices = @transform_3, window_bounds = array<i64: 1, 128>}, {pipeline_mode = #tpu.pipeline_mode<synchronous>, transform_indices = @transform_4, window_bounds = array<i64: 128, 384>}, {pipeline_mode = #tpu.pipeline_mode<synchronous>, transform_indices = @transform_5, window_bounds = array<i64: 1, 384>}, {pipeline_mode = #tpu.pipeline_mode<synchronous>, transform_indices = @transform_6, window_bounds = array<i64: 128, 128>}, {pipeline_mode = #tpu.pipeline_mode<synchronous>, transform_indices = @transform_7, window_bounds = array<i64: 1, 128>}, {pipeline_mode = #tpu.pipeline_mode<synchronous>, transform_indices = @transform_8, window_bounds = array<i64: 1, 128>}, {pipeline_mode = #tpu.pipeline_mode<synchronous>, transform_indices = @transform_9, window_bounds = array<i64: 1, 128>}, {pipeline_mode = #tpu.pipeline_mode<synchronous>, transform_indices = @transform_10, window_bounds = array<i64: 128, 512>}, {pipeline_mode = #tpu.pipeline_mode<synchronous>, transform_indices = @transform_11, window_bounds = array<i64: 1, 512>}, {pipeline_mode = #tpu.pipeline_mode<synchronous>, transform_indices = @transform_12, window_bounds = array<i64: 512, 128>}, {pipeline_mode = #tpu.pipeline_mode<synchronous>, transform_indices = @transform_13, window_bounds = array<i64: 1, 128>}, {transform_indices = @transform_14, window_bounds = array<i64: 1, 8, 128>}]} {
    %c0_i32 = arith.constant 0 : i32
    %0 = arith.cmpi eq, %arg1, %c0_i32 : i32
    %1 = arith.extui %0 : i1 to i32
    %c0_i32_0 = arith.constant 0 : i32
    %2 = arith.cmpi ne, %1, %c0_i32_0 : i32
    scf.if %2 {
      %c0_51 = arith.constant 0 : index
      %c0_52 = arith.constant 0 : index
      %c0_53 = arith.constant 0 : index
      %106 = vector.load %arg2[%c0_51, %c0_52, %c0_53] : memref<1x8x128xf32, #tpu.memory_space<vmem>>, vector<1x8x128xf32>
      %107 = vector.shape_cast %106 : vector<1x8x128xf32> to vector<8x128xf32>
      %c0_54 = arith.constant 0 : index
      %c0_55 = arith.constant 0 : index
      %108 = vector.load %arg4[%c0_54, %c0_55] : memref<1x128xf32, #tpu.memory_space<vmem>>, vector<1x128xf32>
      %c0_56 = arith.constant 0 : index
      %c0_57 = arith.constant 0 : index
      %109 = vector.load %arg5[%c0_56, %c0_57] : memref<1x128xf32, #tpu.memory_space<vmem>>, vector<1x128xf32>
      %cst_58 = arith.constant dense<0.000000e+00> : vector<8xf32>
      %110 = vector.multi_reduction <add>, %107, %cst_58 [1] : vector<8x128xf32> to vector<8xf32>
      %111 = vector.shape_cast %110 : vector<8xf32> to vector<8x1xf32>
      %cst_59 = arith.constant 1.280000e+02 : f32
      %112 = vector.broadcast %cst_59 : f32 to vector<8x1xf32>
      %113 = arith.divf %111, %112 : vector<8x1xf32>
      %114 = vector.broadcast %113 : vector<8x1xf32> to vector<8x128xf32>
      %115 = arith.subf %107, %114 : vector<8x128xf32>
      %116 = arith.mulf %115, %115 : vector<8x128xf32>
      %cst_60 = arith.constant dense<0.000000e+00> : vector<8xf32>
      %117 = vector.multi_reduction <add>, %116, %cst_60 [1] : vector<8x128xf32> to vector<8xf32>
      %118 = vector.shape_cast %117 : vector<8xf32> to vector<8x1xf32>
      %cst_61 = arith.constant 1.280000e+02 : f32
      %119 = vector.broadcast %cst_61 : f32 to vector<8x1xf32>
      %120 = arith.divf %118, %119 : vector<8x1xf32>
      %121 = vector.broadcast %113 : vector<8x1xf32> to vector<8x128xf32>
      %122 = arith.subf %107, %121 : vector<8x128xf32>
      %cst_62 = arith.constant 9.99999974E-6 : f32
      %123 = vector.broadcast %cst_62 : f32 to vector<8x1xf32>
      %124 = arith.addf %120, %123 : vector<8x1xf32>
      %125 = math.rsqrt %124 : vector<8x1xf32>
      %126 = vector.broadcast %125 : vector<8x1xf32> to vector<8x128xf32>
      %127 = arith.mulf %122, %126 : vector<8x128xf32>
      %128 = vector.broadcast %108 : vector<1x128xf32> to vector<8x128xf32>
      %129 = arith.mulf %127, %128 : vector<8x128xf32>
      %130 = vector.broadcast %109 : vector<1x128xf32> to vector<8x128xf32>
      %131 = arith.addf %129, %130 : vector<8x128xf32>
      %132 = arith.truncf %131 : vector<8x128xf32> to vector<8x128xbf16>
      %c0_63 = arith.constant 0 : index
      %c0_64 = arith.constant 0 : index
      %133 = vector.load %arg6[%c0_63, %c0_64] : memref<128x384xbf16, #tpu.memory_space<vmem>>, vector<128x384xbf16>
      %cst_65 = arith.constant dense<0.000000e+00> : vector<8x384xf32>
      %134 = tpu.matmul %132, %133, %cst_65 {dimension_numbers = #tpu.dot_dimension_numbers<[1], [0], [0], [1], [0, 0, 1, 1], [], []>} : vector<8x128xbf16>, vector<128x384xbf16>, vector<8x384xf32> -> vector<8x384xf32>
      %c0_66 = arith.constant 0 : index
      %c0_67 = arith.constant 0 : index
      %135 = vector.load %arg7[%c0_66, %c0_67] : memref<1x384xf32, #tpu.memory_space<vmem>>, vector<1x384xf32>
      %136 = vector.broadcast %135 : vector<1x384xf32> to vector<8x384xf32>
      %137 = arith.addf %134, %136 : vector<8x384xf32>
      %138 = vector.extract_strided_slice %137 {offsets = [0, 0], sizes = [8, 128], strides = [1, 1]} : vector<8x384xf32> to vector<8x128xf32>
      %cst_68 = arith.constant 0.176776692 : f32
      %139 = vector.broadcast %cst_68 : f32 to vector<8x128xf32>
      %140 = arith.mulf %138, %139 : vector<8x128xf32>
      %141 = vector.shape_cast %140 : vector<8x128xf32> to vector<8x4x32xf32>
      %142 = vector.extract_strided_slice %137 {offsets = [0, 128], sizes = [8, 128], strides = [1, 1]} : vector<8x384xf32> to vector<8x128xf32>
      %143 = vector.shape_cast %142 : vector<8x128xf32> to vector<8x4x32xf32>
      %144 = vector.extract_strided_slice %137 {offsets = [0, 256], sizes = [8, 128], strides = [1, 1]} : vector<8x384xf32> to vector<8x128xf32>
      %145 = vector.shape_cast %144 : vector<8x128xf32> to vector<8x4x32xf32>
      %146 = tpu.transpose %141, [1, 0, 2] : vector<8x4x32xf32> -> vector<4x8x32xf32>
      %147 = arith.truncf %146 : vector<4x8x32xf32> to vector<4x8x32xbf16>
      %c0_69 = arith.constant 0 : index
      %c0_70 = arith.constant 0 : index
      %c0_71 = arith.constant 0 : index
      %148 = vector.load %arg17[%c0_69, %c0_70, %c0_71] : memref<4x8x32xbf16, #tpu.memory_space<vmem>>, vector<4x8x32xbf16>
      tpu.vector_store %arg17[%c0_69, %c0_70, %c0_71], %147 {strides = array<i32>} : memref<4x8x32xbf16, #tpu.memory_space<vmem>>, vector<4x8x32xbf16>,
      %149 = tpu.transpose %143, [1, 0, 2] : vector<8x4x32xf32> -> vector<4x8x32xf32>
      %150 = arith.truncf %149 : vector<4x8x32xf32> to vector<4x8x32xbf16>
      %c0_72 = arith.constant 0 : index
      %c0_73 = arith.constant 0 : index
      %c0_74 = arith.constant 0 : index
      %151 = vector.load %arg18[%c0_72, %c0_73, %c0_74] : memref<4x8x32xbf16, #tpu.memory_space<vmem>>, vector<4x8x32xbf16>
      tpu.vector_store %arg18[%c0_72, %c0_73, %c0_74], %150 {strides = array<i32>} : memref<4x8x32xbf16, #tpu.memory_space<vmem>>, vector<4x8x32xbf16>,
      %152 = tpu.transpose %145, [1, 0, 2] : vector<8x4x32xf32> -> vector<4x8x32xf32>
      %153 = arith.truncf %152 : vector<4x8x32xf32> to vector<4x8x32xbf16>
      %c0_75 = arith.constant 0 : index
      %c0_76 = arith.constant 0 : index
      %c0_77 = arith.constant 0 : index
      %154 = vector.load %arg19[%c0_75, %c0_76, %c0_77] : memref<4x8x32xbf16, #tpu.memory_space<vmem>>, vector<4x8x32xbf16>
      tpu.vector_store %arg19[%c0_75, %c0_76, %c0_77], %153 {strides = array<i32>} : memref<4x8x32xbf16, #tpu.memory_space<vmem>>, vector<4x8x32xbf16>,
    } else {
    }
    %c8_i32 = arith.constant 8 : i32
    %3 = arith.muli %arg1, %c8_i32 : i32
    %4 = tpu.assume_multiple %3, 8 : i32
    %c0 = arith.constant 0 : index
    %5 = arith.index_cast %4 : i32 to index
    %c0_1 = arith.constant 0 : index
    %6 = vector.load %arg2[%c0, %5, %c0_1] : memref<1x8x128xf32, #tpu.memory_space<vmem>>, vector<1x8x128xf32>
    %7 = vector.shape_cast %6 : vector<1x8x128xf32> to vector<8x128xf32>
    %c0_2 = arith.constant 0 : index
    %8 = arith.index_cast %4 : i32 to index
    %c0_3 = arith.constant 0 : index
    %9 = vector.load %arg17[%c0_2, %8, %c0_3] : memref<4x8x32xbf16, #tpu.memory_space<vmem>>, vector<4x8x32xbf16>
    %10 = tpu.iota {dimensions = array<i32: 0>} : vector<8x8xi32>
    %11 = vector.broadcast %4 : i32 to vector<8x8xi32>
    %12 = arith.addi %10, %11 : vector<8x8xi32>
    %13 = tpu.iota {dimensions = array<i32: 1>} : vector<8x8xi32>
    %14 = arith.cmpi sle, %13, %12 : vector<8x8xi32>
    %cst = arith.constant 0.000000e+00 : f32
    %cst_4 = arith.constant -1.000000e+09 : f32
    %15 = vector.broadcast %cst : f32 to vector<8x8xf32>
    %16 = vector.broadcast %cst_4 : f32 to vector<8x8xf32>
    %17 = arith.select %14, %15, %16 : vector<8x8xi1>, vector<8x8xf32>
    %c0_5 = arith.constant 0 : index
    %c0_6 = arith.constant 0 : index
    %c0_7 = arith.constant 0 : index
    %18 = vector.load %arg3[%c0_5, %c0_6, %c0_7] : memref<1x1x8xf32, #tpu.memory_space<vmem>>, vector<1x1x8xf32>
    %19 = vector.shape_cast %18 : vector<1x1x8xf32> to vector<1x8xf32>
    %cst_8 = arith.constant 1.000000e+00 : f32
    %20 = vector.broadcast %cst_8 : f32 to vector<1x8xf32>
    %21 = arith.subf %20, %19 : vector<1x8xf32>
    %cst_9 = arith.constant -1.000000e+09 : f32
    %22 = vector.broadcast %cst_9 : f32 to vector<1x8xf32>
    %23 = arith.mulf %21, %22 : vector<1x8xf32>
    %24 = vector.broadcast %23 : vector<1x8xf32> to vector<8x8xf32>
    %25 = arith.addf %17, %24 : vector<8x8xf32>
    %c0_10 = arith.constant 0 : index
    %c0_11 = arith.constant 0 : index
    %c0_12 = arith.constant 0 : index
    %26 = vector.load %arg18[%c0_10, %c0_11, %c0_12] : memref<4x8x32xbf16, #tpu.memory_space<vmem>>, vector<4x8x32xbf16>
    "tpu.trace_start"() <{level = 10 : i32, message = "hqd,hkd->hqk"}> : () -> ()
    %cst_13 = arith.constant dense<0.000000e+00> : vector<4x8x8xf32>
    %27 = tpu.matmul %9, %26, %cst_13 {dimension_numbers = #tpu.dot_dimension_numbers<[2], [2], [1], [1], [0, 0, 0, 1, 1, 1], [0], [0]>} : vector<4x8x32xbf16>, vector<4x8x32xbf16>, vector<4x8x8xf32> -> vector<4x8x8xf32>
    "tpu.trace_stop"() : () -> ()
    %28 = vector.shape_cast %25 : vector<8x8xf32> to vector<1x8x8xf32>
    %29 = vector.broadcast %28 : vector<1x8x8xf32> to vector<4x8x8xf32>
    %30 = arith.addf %27, %29 : vector<4x8x8xf32>
    %cst_14 = arith.constant dense<0xFF800000> : vector<4x8xf32>
    %31 = vector.multi_reduction <maximumf>, %30, %cst_14 [2] : vector<4x8x8xf32> to vector<4x8xf32>
    %32 = vector.shape_cast %31 : vector<4x8xf32> to vector<4x8x1xf32>
    %33 = vector.broadcast %32 : vector<4x8x1xf32> to vector<4x8x8xf32>
    %34 = arith.subf %30, %33 : vector<4x8x8xf32>
    %35 = math.exp %34 : vector<4x8x8xf32>
    %cst_15 = arith.constant dense<0.000000e+00> : vector<4x8xf32>
    %36 = vector.multi_reduction <add>, %35, %cst_15 [2] : vector<4x8x8xf32> to vector<4x8xf32>
    %37 = vector.shape_cast %36 : vector<4x8xf32> to vector<4x8x1xf32>
    %38 = tpu.reciprocal %37 {approx = true} : vector<4x8x1xf32> -> vector<4x8x1xf32>
    %39 = vector.broadcast %38 : vector<4x8x1xf32> to vector<4x8x8xf32>
    %40 = arith.mulf %35, %39 : vector<4x8x8xf32>
    %41 = arith.truncf %40 : vector<4x8x8xf32> to vector<4x8x8xbf16>
    %c0_16 = arith.constant 0 : index
    %c0_17 = arith.constant 0 : index
    %c0_18 = arith.constant 0 : index
    %42 = vector.load %arg19[%c0_16, %c0_17, %c0_18] : memref<4x8x32xbf16, #tpu.memory_space<vmem>>, vector<4x8x32xbf16>
    "tpu.trace_start"() <{level = 10 : i32, message = "hqk,hkd->hqd"}> : () -> ()
    %cst_19 = arith.constant dense<0.000000e+00> : vector<4x8x32xf32>
    %43 = tpu.matmul %41, %42, %cst_19 {dimension_numbers = #tpu.dot_dimension_numbers<[2], [1], [1], [2], [0, 0, 0, 1, 1, 2], [0], [0]>} : vector<4x8x8xbf16>, vector<4x8x32xbf16>, vector<4x8x32xf32> -> vector<4x8x32xf32>
    "tpu.trace_stop"() : () -> ()
    %44 = tpu.transpose %43, [1, 0, 2] : vector<4x8x32xf32> -> vector<8x4x32xf32>
    %45 = vector.shape_cast %44 : vector<8x4x32xf32> to vector<8x128xf32>
    %46 = arith.truncf %45 : vector<8x128xf32> to vector<8x128xbf16>
    %c0_20 = arith.constant 0 : index
    %c0_21 = arith.constant 0 : index
    %47 = vector.load %arg8[%c0_20, %c0_21] : memref<128x128xbf16, #tpu.memory_space<vmem>>, vector<128x128xbf16>
    %cst_22 = arith.constant dense<0.000000e+00> : vector<8x128xf32>
    %48 = tpu.matmul %46, %47, %cst_22 {dimension_numbers = #tpu.dot_dimension_numbers<[1], [0], [0], [1], [0, 0, 1, 1], [], []>} : vector<8x128xbf16>, vector<128x128xbf16>, vector<8x128xf32> -> vector<8x128xf32>
    %49 = arith.addf %7, %48 : vector<8x128xf32>
    %c0_23 = arith.constant 0 : index
    %c0_24 = arith.constant 0 : index
    %50 = vector.load %arg9[%c0_23, %c0_24] : memref<1x128xf32, #tpu.memory_space<vmem>>, vector<1x128xf32>
    %51 = vector.broadcast %50 : vector<1x128xf32> to vector<8x128xf32>
    %52 = arith.addf %49, %51 : vector<8x128xf32>
    %c0_25 = arith.constant 0 : index
    %c0_26 = arith.constant 0 : index
    %53 = vector.load %arg10[%c0_25, %c0_26] : memref<1x128xf32, #tpu.memory_space<vmem>>, vector<1x128xf32>
    %c0_27 = arith.constant 0 : index
    %c0_28 = arith.constant 0 : index
    %54 = vector.load %arg11[%c0_27, %c0_28] : memref<1x128xf32, #tpu.memory_space<vmem>>, vector<1x128xf32>
    %cst_29 = arith.constant dense<0.000000e+00> : vector<8xf32>
    %55 = vector.multi_reduction <add>, %52, %cst_29 [1] : vector<8x128xf32> to vector<8xf32>
    %56 = vector.shape_cast %55 : vector<8xf32> to vector<8x1xf32>
    %cst_30 = arith.constant 1.280000e+02 : f32
    %57 = vector.broadcast %cst_30 : f32 to vector<8x1xf32>
    %58 = arith.divf %56, %57 : vector<8x1xf32>
    %59 = vector.broadcast %58 : vector<8x1xf32> to vector<8x128xf32>
    %60 = arith.subf %52, %59 : vector<8x128xf32>
    %61 = arith.mulf %60, %60 : vector<8x128xf32>
    %cst_31 = arith.constant dense<0.000000e+00> : vector<8xf32>
    %62 = vector.multi_reduction <add>, %61, %cst_31 [1] : vector<8x128xf32> to vector<8xf32>
    %63 = vector.shape_cast %62 : vector<8xf32> to vector<8x1xf32>
    %cst_32 = arith.constant 1.280000e+02 : f32
    %64 = vector.broadcast %cst_32 : f32 to vector<8x1xf32>
    %65 = arith.divf %63, %64 : vector<8x1xf32>
    %66 = vector.broadcast %58 : vector<8x1xf32> to vector<8x128xf32>
    %67 = arith.subf %52, %66 : vector<8x128xf32>
    %cst_33 = arith.constant 9.99999974E-6 : f32
    %68 = vector.broadcast %cst_33 : f32 to vector<8x1xf32>
    %69 = arith.addf %65, %68 : vector<8x1xf32>
    %70 = math.rsqrt %69 : vector<8x1xf32>
    %71 = vector.broadcast %70 : vector<8x1xf32> to vector<8x128xf32>
    %72 = arith.mulf %67, %71 : vector<8x128xf32>
    %73 = vector.broadcast %53 : vector<1x128xf32> to vector<8x128xf32>
    %74 = arith.mulf %72, %73 : vector<8x128xf32>
    %75 = vector.broadcast %54 : vector<1x128xf32> to vector<8x128xf32>
    %76 = arith.addf %74, %75 : vector<8x128xf32>
    %77 = arith.truncf %76 : vector<8x128xf32> to vector<8x128xbf16>
    %c0_34 = arith.constant 0 : index
    %c0_35 = arith.constant 0 : index
    %78 = vector.load %arg12[%c0_34, %c0_35] : memref<128x512xbf16, #tpu.memory_space<vmem>>, vector<128x512xbf16>
    %cst_36 = arith.constant dense<0.000000e+00> : vector<8x512xf32>
    %79 = tpu.matmul %77, %78, %cst_36 {dimension_numbers = #tpu.dot_dimension_numbers<[1], [0], [0], [1], [0, 0, 1, 1], [], []>} : vector<8x128xbf16>, vector<128x512xbf16>, vector<8x512xf32> -> vector<8x512xf32>
    %c0_37 = arith.constant 0 : index
    %c0_38 = arith.constant 0 : index
    %80 = vector.load %arg13[%c0_37, %c0_38] : memref<1x512xf32, #tpu.memory_space<vmem>>, vector<1x512xf32>
    %81 = vector.broadcast %80 : vector<1x512xf32> to vector<8x512xf32>
    %82 = arith.addf %79, %81 : vector<8x512xf32>
    %83 = arith.mulf %82, %82 : vector<8x512xf32>
    %84 = arith.mulf %82, %83 : vector<8x512xf32>
    %cst_39 = arith.constant 4.471500e-02 : f32
    %85 = vector.broadcast %cst_39 : f32 to vector<8x512xf32>
    %86 = arith.mulf %85, %84 : vector<8x512xf32>
    %87 = arith.addf %82, %86 : vector<8x512xf32>
    %cst_40 = arith.constant 0.797884583 : f32
    %88 = vector.broadcast %cst_40 : f32 to vector<8x512xf32>
    %89 = arith.mulf %88, %87 : vector<8x512xf32>
    %90 = math.tanh %89 : vector<8x512xf32>
    %cst_41 = arith.constant 1.000000e+00 : f32
    %91 = vector.broadcast %cst_41 : f32 to vector<8x512xf32>
    %92 = arith.addf %91, %90 : vector<8x512xf32>
    %cst_42 = arith.constant 5.000000e-01 : f32
    %93 = vector.broadcast %cst_42 : f32 to vector<8x512xf32>
    %94 = arith.mulf %93, %92 : vector<8x512xf32>
    %95 = arith.mulf %82, %94 : vector<8x512xf32>
    %96 = arith.truncf %95 : vector<8x512xf32> to vector<8x512xbf16>
    %c0_43 = arith.constant 0 : index
    %c0_44 = arith.constant 0 : index
    %97 = vector.load %arg14[%c0_43, %c0_44] : memref<512x128xbf16, #tpu.memory_space<vmem>>, vector<512x128xbf16>
    %cst_45 = arith.constant dense<0.000000e+00> : vector<8x128xf32>
    %98 = tpu.matmul %96, %97, %cst_45 {dimension_numbers = #tpu.dot_dimension_numbers<[1], [0], [0], [1], [0, 0, 1, 1], [], []>} : vector<8x512xbf16>, vector<512x128xbf16>, vector<8x128xf32> -> vector<8x128xf32>
    %c0_46 = arith.constant 0 : index
    %c0_47 = arith.constant 0 : index
    %99 = vector.load %arg15[%c0_46, %c0_47] : memref<1x128xf32, #tpu.memory_space<vmem>>, vector<1x128xf32>
    %100 = vector.broadcast %99 : vector<1x128xf32> to vector<8x128xf32>
    %101 = arith.addf %98, %100 : vector<8x128xf32>
    %102 = arith.addf %52, %101 : vector<8x128xf32>
    %c0_48 = arith.constant 0 : index
    %c0_49 = arith.constant 0 : index
    %c0_50 = arith.constant 0 : index
    %103 = vector.load %arg16[%c0_48, %c0_49, %c0_50] : memref<1x8x128xf32, #tpu.memory_space<vmem>>, vector<1x8x128xf32>
    %104 = vector.shape_cast %103 : vector<1x8x128xf32> to vector<8x128xf32>
    %105 = vector.shape_cast %102 : vector<8x128xf32> to vector<1x8x128xf32>
    tpu.vector_store %arg16[%c0_48, %c0_49, %c0_50], %105 {strides = array<i32>} : memref<1x8x128xf32, #tpu.memory_space<vmem>>, vector<1x8x128xf32>,
    return
  }
  func.func @transform_0(%arg0: i32, %arg1: i32) -> (i32, i32, i32) {
    %c0_i32 = arith.constant 0 : i32
    %c0_i32_0 = arith.constant 0 : i32
    %c0_i32_1 = arith.constant 0 : i32
    return %arg0, %c0_i32, %c0_i32_0 : i32, i32, i32
  }
  func.func @transform_1(%arg0: i32, %arg1: i32) -> (i32, i32, i32) {
    %c0_i32 = arith.constant 0 : i32
    %c0_i32_0 = arith.constant 0 : i32
    %c0_i32_1 = arith.constant 0 : i32
    return %arg0, %c0_i32, %c0_i32_0 : i32, i32, i32
  }
  func.func @transform_2(%arg0: i32, %arg1: i32) -> (i32, i32) {
    %c0_i32 = arith.constant 0 : i32
    %c0_i32_0 = arith.constant 0 : i32
    %c0_i32_1 = arith.constant 0 : i32
    return %c0_i32, %c0_i32_0 : i32, i32
  }
  func.func @transform_3(%arg0: i32, %arg1: i32) -> (i32, i32) {
    %c0_i32 = arith.constant 0 : i32
    %c0_i32_0 = arith.constant 0 : i32
    %c0_i32_1 = arith.constant 0 : i32
    return %c0_i32, %c0_i32_0 : i32, i32
  }
  func.func @transform_4(%arg0: i32, %arg1: i32) -> (i32, i32) {
    %c0_i32 = arith.constant 0 : i32
    %c0_i32_0 = arith.constant 0 : i32
    %c0_i32_1 = arith.constant 0 : i32
    return %c0_i32, %c0_i32_0 : i32, i32
  }
  func.func @transform_5(%arg0: i32, %arg1: i32) -> (i32, i32) {
    %c0_i32 = arith.constant 0 : i32
    %c0_i32_0 = arith.constant 0 : i32
    %c0_i32_1 = arith.constant 0 : i32
    return %c0_i32, %c0_i32_0 : i32, i32
  }
  func.func @transform_6(%arg0: i32, %arg1: i32) -> (i32, i32) {
    %c0_i32 = arith.constant 0 : i32
    %c0_i32_0 = arith.constant 0 : i32
    %c0_i32_1 = arith.constant 0 : i32
    return %c0_i32, %c0_i32_0 : i32, i32
  }
  func.func @transform_7(%arg0: i32, %arg1: i32) -> (i32, i32) {
    %c0_i32 = arith.constant 0 : i32
    %c0_i32_0 = arith.constant 0 : i32
    %c0_i32_1 = arith.constant 0 : i32
    return %c0_i32, %c0_i32_0 : i32, i32
  }
  func.func @transform_8(%arg0: i32, %arg1: i32) -> (i32, i32) {
    %c0_i32 = arith.constant 0 : i32
    %c0_i32_0 = arith.constant 0 : i32
    %c0_i32_1 = arith.constant 0 : i32
    return %c0_i32, %c0_i32_0 : i32, i32
  }
  func.func @transform_9(%arg0: i32, %arg1: i32) -> (i32, i32) {
    %c0_i32 = arith.constant 0 : i32
    %c0_i32_0 = arith.constant 0 : i32
    %c0_i32_1 = arith.constant 0 : i32
    return %c0_i32, %c0_i32_0 : i32, i32
  }
  func.func @transform_10(%arg0: i32, %arg1: i32) -> (i32, i32) {
    %c0_i32 = arith.constant 0 : i32
    %c0_i32_0 = arith.constant 0 : i32
    %c0_i32_1 = arith.constant 0 : i32
    return %c0_i32, %c0_i32_0 : i32, i32
  }
  func.func @transform_11(%arg0: i32, %arg1: i32) -> (i32, i32) {
    %c0_i32 = arith.constant 0 : i32
    %c0_i32_0 = arith.constant 0 : i32
    %c0_i32_1 = arith.constant 0 : i32
    return %c0_i32, %c0_i32_0 : i32, i32
  }
  func.func @transform_12(%arg0: i32, %arg1: i32) -> (i32, i32) {
    %c0_i32 = arith.constant 0 : i32
    %c0_i32_0 = arith.constant 0 : i32
    %c0_i32_1 = arith.constant 0 : i32
    return %c0_i32, %c0_i32_0 : i32, i32
  }
  func.func @transform_13(%arg0: i32, %arg1: i32) -> (i32, i32) {
    %c0_i32 = arith.constant 0 : i32
    %c0_i32_0 = arith.constant 0 : i32
    %c0_i32_1 = arith.constant 0 : i32
    return %c0_i32, %c0_i32_0 : i32, i32
  }
  func.func @transform_14(%arg0: i32, %arg1: i32) -> (i32, i32, i32) {
    %c0_i32 = arith.constant 0 : i32
    %c0_i32_0 = arith.constant 0 : i32
    return %arg0, %arg1, %c0_i32 : i32, i32, i32
  }
}

</mosaic_0001>

<bundles_post_ra>
// kernel: tpu_custom_call.1
= control target key start
LH: loop header
LB: loop body
LE: loop exit
PB: predicated region body
PF: predicated region fallthrough
CT: control target
= control target key end

     0   :  { %6 = vsyncpa [#allocation3], 0  ;;  %s340_s0 = inlined_call_operand.hbm [shape: f32[8,128], index: 0, kind: input, shape index: {}]   ;;  %s341_s1 = inlined_call_operand.hbm [shape: f32[8,128], index: 1, kind: output, shape index: {}]  }
   0x1   :  { %7 = vsyncpa [#allocation4], 0  ;;  %s261_s6 = smov 0  }
   0x2 LB: > { %s144_s7 = sadd.s32 4294967295, %s247_s6   ;;  %p145_p0 = scmp.ge.s32.totalorder %s247_s6, 1  ;;  %s247_s6 = sphi %s261_s6, %s13_s6  }
   0x3   : > { %p60_p1 = scmp.lt.s32.totalorder %s247_s6, 3  ;;  %p275_p3 = scmp.eq.s32.totalorder %s144_s7, 0 }
   0x4   : > { %s249_s10 = smov [#allocation2]   ;;  %s179_s15 = scalar_lea.hbm %s340_s0, 128 }
   0x5   : > { %p269_p2 = pnand %p145_p0, %p60_p1  ;;  %s73_s11 = sshll.u32 %s249_s10, 4  ;;  %s74_s11 = int_to_ptr.vmem [resolvable:$true] %s73_s11 }
   0x6   : > { %s346_s9 = scalar_select %p275_p3, 1, 0 }
   0x7   : > { %s345_s8 = scalar_select %p269_p2, 1, 0 }
   0x8   : > { %p161_p4 = pneg %p269_p2  ;;  %p180_p6 = scmp.ne.s32.totalorder %s340_s0, %s179_s15 }
   0x9   : > { %p186_p10 = scmp.lt.u32.totalorder %s179_s15, %s340_s0 }
   0xa   : > { %p283_p5 = pnand %p275_p3, %p161_p4 }
   0xc   : > { %p181_p7 = pneg %p283_p5 }
   0xe   : > { %p182_p8 = pnand %p181_p7, %p180_p6 }
  0x10   : > { %p183_p9 = pneg %p182_p8 }
  0x12   : > { %p188_p11 = pnand %p186_p10, %p183_p9 }
  0x14   : > { %191 = shalt.err (!%p188_p11)
}
  0x15   : > { %s192_s20 = scalar_lea.vmem %s74_s11, 128  ;;  %p200_p1 = scmp.lt.s32.totalorder %s74_s11, %s74_s11 }
  0x16   : > { %p193_p12 = scmp.ne.s32.totalorder %s74_s11, %s192_s20  ;;  %p201_p4 = scmp.lt.s32.totalorder %s192_s20, %s192_s20 }
  0x18   : > { %p195_p13 = pnand %p193_p12, %p181_p7  ;;  %p202_p3 = por %p201_p4, %p200_p1 }
  0x1a   : > { %p196_p0 = pneg %p195_p13 }
  0x1c   : > { %p203_p2 = pnand %p202_p3, %p196_p0 }
  0x1e   : > { %206 = shalt.err (!%p203_p2)
}
  0x1f   : > { %164 = dma.hbm_to_vmem [thread:$0]  (!%p283_p5), %s340_s0, 128, %s74_s11, [#allocation3]  }
  0x20   : > { %p348_p6 = scmp.ne.s32.totalorder %s345_s8, 0 }
  0x21   : > { %p349_p8 = scmp.ne.s32.totalorder (!%p348_p6), %s346_s9, 0 }
  0x22   : > { %86 = sbr.rel (%p348_p6) target bundleno = 67 (0x43), region = 24 }
  0x29   : > { %238 = dma.done.wait (%p349_p8), [#allocation3], 128  }
  0x2a   : > { %240 = vsyncadd (%p349_p8), [#allocation3], 4294967168  ;;  %s250_s23 = smov [#allocation5]   ;;  %p311_p2 = scmp.eq.s32.totalorder %s144_s7, 1  ;;  %v96_v0 = vld [vmem:[#allocation2] sm:$0xff] }
  0x2b   : > { %s105_s24 = sshll.u32 %s250_s23, 4  ;;  %97 = vst [vmem:[#allocation5] sm:$0xff] %v96_v0  ;;  %s106_s24 = int_to_ptr.vmem [resolvable:$true] %s105_s24 }
  0x2c   : > { %s207_s26 = scalar_lea.vmem %s106_s24, 128  ;;  %p214_p9 = scmp.lt.s32.totalorder %s106_s24, %s106_s24 }
  0x2d   : > { %p208_p3 = scmp.ne.s32.totalorder %s106_s24, %s207_s26  ;;  %p215_p10 = scmp.lt.s32.totalorder %s207_s26, %s207_s26 }
  0x2f   : > { %p209_p5 = pnand %p208_p3, %p311_p2  ;;  %p216_p11 = por %p215_p10, %p214_p9 }
  0x31   : > { %p210_p7 = pneg %p209_p5 }
  0x33   : > { %p217_p12 = pnand %p216_p11, %p210_p7 }
  0x35   : > { %220 = shalt.err (!%p217_p12)
}
  0x36   : > { %s221_s29 = scalar_lea.hbm %s341_s1, 128 }
  0x37   : > { %p222_p13 = scmp.ne.s32.totalorder %s341_s1, %s221_s29  ;;  %p227_p4 = scmp.lt.u32.totalorder %s221_s29, %s341_s1 }
  0x39   : > { %p223_p0 = pnand %p222_p13, %p311_p2 }
  0x3b   : > { %p224_p1 = pneg %p223_p0 }
  0x3d   : > { %p229_p6 = pnand %p227_p4, %p224_p1 }
  0x3f   : > { %232 = shalt.err (!%p229_p6)
}
  0x40   : > { %158 = dma.vmem_to_hbm [thread:$0]  (%p311_p2), %s106_s24, 128, %s341_s1, [#allocation4]  }
  0x41   : > { %242 = dma.done.wait (%p311_p2), [#allocation4], 128  }
  0x42   : > { %244 = vsyncadd (%p311_p2), [#allocation4], 4294967168 }
  0x43 PF: > { %s13_s6 = sadd.s32 1, %s247_s6  }
  0x44   : > { %p10_p8 = scmp.ge.s32.totalorder %s13_s6, 4  }
  0x46   :  { %12 = sbr.rel (!%p10_p8) target bundleno = 2 (0x2), region = 53 }
  0x4d   :  { %118 = vsyncpa [#allocation3], 1 }
  0x4e   :  { %120 = vsyncpa [#allocation3 + $0x1], 1 }
  0x4f   :  { %121 = vsyncpa [#allocation4], 1 }
  0x50   :  { %123 = vsyncpa [#allocation4 + $0x1], 1 }

// kernel: tpu_custom_call.1
= control target key start
LH: loop header
LB: loop body
LE: loop exit
PB: predicated region body
PF: predicated region fallthrough
CT: control target
= control target key end

     0   :  { %s5142_s0 = inlined_call_operand.hbm [shape: f32[2,8,128], index: 0, kind: input, shape index: {}]   ;;  %s5143_s1 = inlined_call_operand.hbm [shape: f32[2,1,8], index: 1, kind: input, shape index: {}]   ;;  %s5144_s2 = inlined_call_operand.hbm [shape: f32[1,128], index: 2, kind: input, shape index: {}]   ;;  %s5145_s3 = inlined_call_operand.hbm [shape: f32[1,128], index: 3, kind: input, shape index: {}]   ;;  %s5146_s4 = inlined_call_operand.hbm [shape: bf16[128,384], index: 4, kind: input, shape index: {}]   ;;  %s5147_s5 = inlined_call_operand.hbm [shape: f32[1,384], index: 5, kind: input, shape index: {}]   ;;  %s5148_s6 = inlined_call_operand.hbm [shape: bf16[128,128], index: 6, kind: input, shape index: {}]   ;;  %s5149_s7 = inlined_call_operand.hbm [shape: f32[1,128], index: 7, kind: input, shape index: {}]   ;;  %s5150_s8 = inlined_call_operand.hbm [shape: f32[1,128], index: 8, kind: input, shape index: {}]   ;;  %s5151_s9 = inlined_call_operand.hbm [shape: f32[1,128], index: 9, kind: input, shape index: {}]   ;;  %s5152_s10 = inlined_call_operand.hbm [shape: bf16[128,512], index: 10, kind: input, shape index: {}]   ;;  %s5153_s11 = inlined_call_operand.hbm [shape: f32[1,512], index: 11, kind: input, shape index: {}]   ;;  %s5154_s12 = inlined_call_operand.hbm [shape: bf16[512,128], index: 12, kind: input, shape index: {}]   ;;  %s5155_s13 = inlined_call_operand.hbm [shape: f32[1,128], index: 13, kind: input, shape index: {}]   ;;  %s5156_s14 = inlined_call_operand.hbm [shape: f32[2,8,128], index: 14, kind: output, shape index: {}]  }
   0x1   :  { %5170 = sst [smem:[#allocation42_spill]] %s5142_s0 }
   0x2   :  { %5171 = sst [smem:[#allocation43_spill]] %s5143_s1 }
   0x3   :  { %5172 = sst [smem:[#allocation44_spill]] %s5144_s2 }
   0x4   :  { %5173 = sst [smem:[#allocation45_spill]] %s5145_s3 }
   0x5   :  { %5174 = sst [smem:[#allocation46_spill]] %s5146_s4 }
   0x6   :  { %5175 = sst [smem:[#allocation47_spill]] %s5147_s5 }
   0x7   :  { %5176 = sst [smem:[#allocation48_spill]] %s5148_s6 }
   0x8   :  { %5177 = sst [smem:[#allocation49_spill]] %s5149_s7 }
   0x9   :  { %5178 = sst [smem:[#allocation50_spill]] %s5150_s8 }
   0xa   :  { %5179 = sst [smem:[#allocation51_spill]] %s5156_s14 }
   0xb   :  { %19 = vsyncpa [#allocation6], 0 }
   0xc   :  { %21 = vsyncpa [#allocation6 + $0x1], 0 }
   0xd   :  { %22 = vsyncpa [#allocation9], 0 }
   0xe   :  { %24 = vsyncpa [#allocation9 + $0x1], 0 }
   0xf   :  { %25 = vsyncpa [#allocation12], 0 }
  0x10   :  { %26 = vsyncpa [#allocation15], 0 }
  0x11   :  { %27 = vsyncpa [#allocation18], 0 }
  0x12   :  { %28 = vsyncpa [#allocation21], 0 }
  0x13   :  { %29 = vsyncpa [#allocation24], 0 }
  0x14   :  { %30 = vsyncpa [#allocation27], 0 }
  0x15   :  { %31 = vsyncpa [#allocation7], 0 }
  0x16   :  { %33 = vsyncpa [#allocation7 + $0x1], 0  ;;  %s4401_s29 = smov 0   ;;  %s4403_s30 = smov 0  }
  0x17   :  { %s4405_s15 = smov 0   ;;  %s4407_s16 = smov 0  }
  0x18   :  { %s4409_s17 = smov 0   ;;  %s4411_s18 = smov 0  }
  0x19 LB: > { %5180 = sst [smem:[#allocation39_spill]] %s4286_s16  ;;  %s4432_s19 = sadd.s32 4294967295, %s4294_s18   ;;  %s4294_s18 = sphi %s4411_s18, %s39_s18   ;;  %s4290_s17 = sphi %s4409_s17, %s5232_s17   ;;  %s4286_s16 = sphi %s4407_s16, %s5231_s16   ;;  %s4282_s15 = sphi %s4405_s15, %s5230_s15   ;;  %s4278_s30 = sphi %s4403_s30, %s5229_s30   ;;  %s4274_s29 = sphi %s4401_s29, %s5228_s29  }
  0x1a   : > { %5181 = sst [smem:[#allocation40_spill]] %s4432_s19  ;;  %p3113_p0 = scmp.ge.s32.totalorder %s4294_s18, 1 }
  0x1b   : > { %p5160_p1 = scmp.eq.s32.totalorder %s4432_s19, 0  ;;  %p388_p2 = scmp.lt.s32.totalorder %s4294_s18, 3 }
  0x1c   : > { %s4296_s21 = smov [#allocation10]   ;;  %s4297_s23 = smov [#allocation11]  }
  0x1d   : > { %p4437_p3 = pnand %p3113_p0, %p388_p2  ;;  %s401_s22 = sshll.u32 %s4296_s21, 4  ;;  %s402_s22 = int_to_ptr.vmem [resolvable:$true] %s401_s22 }
  0x1e   : > { %s412_s24 = sshll.u32 %s4297_s23, 4  ;;  %s4298_s26 = smov [#allocation14]   ;;  %s4450_s24 = int_to_ptr.vmem [resolvable:$true] %s412_s24 }
  0x1f   : > { %s5182_s20 = scalar_select %p4437_p3, 1, 0 }
  0x20   : > { %p3487_p5 = pneg %p4437_p3  ;;  %s436_s27 = sshll.u32 %s4298_s26, 4  ;;  %s4452_s27 = int_to_ptr.vmem [resolvable:$true] %s436_s27 }
  0x21   : > { %5183 = sst [smem:[#allocation41_spill]] %s5182_s20  ;;  %s5185_s2 = sld [smem:[#allocation44_spill]] }
  0x22   : > { %p4446_p6 = pnand %p3487_p5, %p5160_p1 }
  0x24   : > { %p4462_p8 = pneg %p4446_p6 }
  0x27   : > { %s3784_s14 = scalar_lea.hbm %s5185_s2, 16 }
  0x28   : > { %p3785_p7 = scmp.ne.s32.totalorder %s5185_s2, %s3784_s14  ;;  %p3791_p11 = scmp.lt.u32.totalorder %s3784_s14, %s5185_s2 }
  0x2a   : > { %p3787_p9 = pnand %p4462_p8, %p3785_p7 }
  0x2c   : > { %p3788_p10 = pneg %p3787_p9 }
  0x2e   : > { %p3793_p12 = pnand %p3791_p11, %p3788_p10 }
  0x30   : > { %3796 = shalt.err (!%p3793_p12)
}
  0x31   : > { %s3797_s28 = scalar_lea.vmem %s402_s22, 16  ;;  %s3804_s16 = scalar_lea.vmem %s402_s22, 32 }
  0x32   : > { %p3798_p13 = scmp.ne.s32.totalorder %s402_s22, %s3797_s28  ;;  %p3805_p5 = scmp.lt.s32.totalorder %s402_s22, %s402_s22 }
  0x33   : > { %p3806_p4 = scmp.lt.s32.totalorder %s3804_s16, %s3797_s28 }
  0x34   : > { %p3800_p0 = pnand %p3798_p13, %p4462_p8 }
  0x35   : > { %p3807_p1 = por %p3806_p4, %p3805_p5 }
  0x36   : > { %p3801_p2 = pneg %p3800_p0 }
  0x38   : > { %p3808_p3 = pnand %p3807_p1, %p3801_p2 }
  0x3a   : > { %3811 = shalt.err (!%p3808_p3)
}
  0x3b   : > { %3490 = dma.hbm_to_vmem [thread:$0]  (!%p4446_p6), %s5185_s2, 16, %s402_s22, [#allocation9]  }
  0x3c   : > { %s5187_s3 = sld [smem:[#allocation45_spill]] }
  0x42   : > { %s3812_s26 = scalar_lea.hbm %s5187_s3, 16 }
  0x43   : > { %p3813_p7 = scmp.ne.s32.totalorder %s5187_s3, %s3812_s26  ;;  %p3819_p1 = scmp.lt.u32.totalorder %s3812_s26, %s5187_s3 }
  0x45   : > { %p3815_p9 = pnand %p3813_p7, %p4462_p8 }
  0x47   : > { %p3816_p4 = pneg %p3815_p9 }
  0x49   : > { %p3821_p3 = pnand %p3819_p1, %p3816_p4 }
  0x4b   : > { %3824 = shalt.err (!%p3821_p3)
}
  0x4c   : > { %s3825_s22 = scalar_lea.vmem %s4450_s24, 16  ;;  %s3832_s0 = scalar_lea.vmem %s4450_s24, 32 }
  0x4d   : > { %p3826_p10 = scmp.ne.s32.totalorder %s4450_s24, %s3825_s22  ;;  %p3833_p13 = scmp.lt.s32.totalorder %s4450_s24, %s4450_s24 }
  0x4e   : > { %p3834_p0 = scmp.lt.s32.totalorder %s3832_s0, %s3825_s22 }
  0x4f   : > { %p3828_p11 = pnand %p3826_p10, %p4462_p8 }
  0x50   : > { %p3835_p2 = por %p3834_p0, %p3833_p13 }
  0x51   : > { %p3829_p12 = pneg %p3828_p11 }
  0x53   : > { %p3836_p5 = pnand %p3835_p2, %p3829_p12 }
  0x55   : > { %3839 = shalt.err (!%p3836_p5)
}
  0x56   : > { %3493 = dma.hbm_to_vmem [thread:$0]  (!%p4446_p6), %s5187_s3, 16, %s4450_s24, [#allocation12]  }
  0x57   : > { %s5188_s5 = sld [smem:[#allocation47_spill]] }
  0x5d   : > { %s3840_s14 = scalar_lea.hbm %s5188_s5, 48 }
  0x5e   : > { %p3841_p7 = scmp.ne.s32.totalorder %s5188_s5, %s3840_s14  ;;  %p3847_p1 = scmp.lt.u32.totalorder %s3840_s14, %s5188_s5 }
  0x60   : > { %p3843_p9 = pnand %p3841_p7, %p4462_p8 }
  0x62   : > { %p3844_p4 = pneg %p3843_p9 }
  0x64   : > { %p3849_p3 = pnand %p3847_p1, %p3844_p4 }
  0x66   : > { %3852 = shalt.err (!%p3849_p3)
}
  0x67   : > { %s3853_s24 = scalar_lea.vmem %s4452_s27, 48  ;;  %s3860_s0 = scalar_lea.vmem %s4452_s27, 64 }
  0x68   : > { %p3854_p10 = scmp.ne.s32.totalorder %s4452_s27, %s3853_s24  ;;  %p3861_p13 = scmp.lt.s32.totalorder %s4452_s27, %s4452_s27 }
  0x69   : > { %p3862_p0 = scmp.lt.s32.totalorder %s3860_s0, %s3853_s24 }
  0x6a   : > { %p3856_p11 = pnand %p3854_p10, %p4462_p8 }
  0x6b   : > { %p3863_p2 = por %p3862_p0, %p3861_p13 }
  0x6c   : > { %p3857_p12 = pneg %p3856_p11 }
  0x6e   : > { %p3864_p5 = pnand %p3863_p2, %p3857_p12 }
  0x70   : > { %3867 = shalt.err (!%p3864_p5)
}
  0x71   : > { %3499 = dma.hbm_to_vmem [thread:$0]  (!%p4446_p6), %s5188_s5, 48, %s4452_s27, [#allocation15]  }
  0x72   : > { %s4299_s21 = smov [#allocation17]   ;;  %s4300_s14 = smov [#allocation20]  }
  0x73   : > { %s460_s1 = sshll.u32 %s4299_s21, 4  ;;  %s482_s26 = sshll.u32 %s4300_s14, 4  ;;  %s461_s1 = int_to_ptr.vmem [resolvable:$true] %s460_s1  ;;  %s483_s26 = int_to_ptr.vmem [resolvable:$true] %s482_s26 }
  0x74   : > { %s5189_s7 = sld [smem:[#allocation49_spill]] }
  0x7a   : > { %s3868_s22 = scalar_lea.hbm %s5189_s7, 16 }
  0x7b   : > { %p3869_p7 = scmp.ne.s32.totalorder %s5189_s7, %s3868_s22  ;;  %p3875_p1 = scmp.lt.u32.totalorder %s3868_s22, %s5189_s7 }
  0x7d   : > { %p3871_p9 = pnand %p3869_p7, %p4462_p8 }
  0x7f   : > { %p3872_p4 = pneg %p3871_p9 }
  0x81   : > { %p3877_p3 = pnand %p3875_p1, %p3872_p4 }
  0x83   : > { %3880 = shalt.err (!%p3877_p3)
}
  0x84   : > { %s3881_s27 = scalar_lea.vmem %s461_s1, 16  ;;  %s3888_s20 = scalar_lea.vmem %s461_s1, 32 }
  0x85   : > { %p3882_p10 = scmp.ne.s32.totalorder %s461_s1, %s3881_s27  ;;  %p3889_p13 = scmp.lt.s32.totalorder %s461_s1, %s461_s1 }
  0x86   : > { %p3890_p0 = scmp.lt.s32.totalorder %s3888_s20, %s3881_s27 }
  0x87   : > { %p3884_p11 = pnand %p3882_p10, %p4462_p8 }
  0x88   : > { %p3891_p2 = por %p3890_p0, %p3889_p13 }
  0x89   : > { %p3885_p12 = pneg %p3884_p11 }
  0x8b   : > { %p3892_p5 = pnand %p3891_p2, %p3885_p12 }
  0x8d   : > { %3895 = shalt.err (!%p3892_p5)
}
  0x8e   : > { %3505 = dma.hbm_to_vmem [thread:$0]  (!%p4446_p6), %s5189_s7, 16, %s461_s1, [#allocation18]  }
  0x8f   : > { %s3896_s16 = scalar_lea.hbm %s5151_s9, 16 }
  0x90   : > { %p3897_p7 = scmp.ne.s32.totalorder %s5151_s9, %s3896_s16  ;;  %p3903_p1 = scmp.lt.u32.totalorder %s3896_s16, %s5151_s9 }
  0x92   : > { %p3899_p9 = pnand %p3897_p7, %p4462_p8 }
  0x94   : > { %p3900_p4 = pneg %p3899_p9 }
  0x96   : > { %p3905_p3 = pnand %p3903_p1, %p3900_p4 }
  0x98   : > { %3908 = shalt.err (!%p3905_p3)
}
  0x99   : > { %s3909_s27 = scalar_lea.vmem %s483_s26, 16  ;;  %s3916_s1 = scalar_lea.vmem %s483_s26, 32 }
  0x9a   : > { %p3910_p10 = scmp.ne.s32.totalorder %s483_s26, %s3909_s27  ;;  %p3917_p13 = scmp.lt.s32.totalorder %s483_s26, %s483_s26 }
  0x9b   : > { %p3918_p0 = scmp.lt.s32.totalorder %s3916_s1, %s3909_s27 }
  0x9c   : > { %p3912_p11 = pnand %p3910_p10, %p4462_p8 }
  0x9d   : > { %p3919_p2 = por %p3918_p0, %p3917_p13 }
  0x9e   : > { %p3913_p12 = pneg %p3912_p11 }
  0xa0   : > { %p3920_p5 = pnand %p3919_p2, %p3913_p12 }
  0xa2   : > { %3923 = shalt.err (!%p3920_p5)
}
  0xa3   : > { %3511 = dma.hbm_to_vmem [thread:$0]  (!%p4446_p6), %s5151_s9, 16, %s483_s26, [#allocation21]  }
  0xa4   : > { %s4301_s14 = smov [#allocation23]   ;;  %s4302_s28 = smov [#allocation13]  }
  0xa5   : > { %s506_s2 = sshll.u32 %s4301_s14, 4  ;;  %s422_s16 = sshll.u32 %s4302_s28, 4  ;;  %s507_s2 = int_to_ptr.vmem [resolvable:$true] %s506_s2  ;;  %s423_s16 = int_to_ptr.vmem [resolvable:$true] %s422_s16 }
  0xa6   : > { %s3924_s0 = scalar_lea.hbm %s5153_s11, 64 }
  0xa7   : > { %p3925_p7 = scmp.ne.s32.totalorder %s5153_s11, %s3924_s0  ;;  %p3931_p1 = scmp.lt.u32.totalorder %s3924_s0, %s5153_s11 }
  0xa9   : > { %p3927_p9 = pnand %p3925_p7, %p4462_p8 }
  0xab   : > { %p3928_p4 = pneg %p3927_p9 }
  0xad   : > { %p3933_p3 = pnand %p3931_p1, %p3928_p4 }
  0xaf   : > { %3936 = shalt.err (!%p3933_p3)
}
  0xb0   : > { %s3937_s26 = scalar_lea.vmem %s507_s2, 64  ;;  %p3945_p13 = scmp.lt.s32.totalorder %s507_s2, %s507_s2 }
  0xb1   : > { %p3938_p10 = scmp.ne.s32.totalorder %s507_s2, %s3937_s26  ;;  %p3946_p0 = scmp.lt.s32.totalorder %s3937_s26, %s3937_s26 }
  0xb3   : > { %p3940_p11 = pnand %p3938_p10, %p4462_p8  ;;  %p3947_p2 = por %p3946_p0, %p3945_p13 }
  0xb5   : > { %p3941_p12 = pneg %p3940_p11 }
  0xb7   : > { %p3948_p5 = pnand %p3947_p2, %p3941_p12 }
  0xb9   : > { %3951 = shalt.err (!%p3948_p5)
}
  0xba   : > { %3517 = dma.hbm_to_vmem [thread:$0]  (!%p4446_p6), %s5153_s11, 64, %s507_s2, [#allocation24]  }
  0xbb   : > { %s5190_s4 = sld [smem:[#allocation46_spill]] }
  0xc1   : > { %s3952_s24 = scalar_lea.hbm %s5190_s4, 3072 }
  0xc2   : > { %p3953_p7 = scmp.ne.s32.totalorder %s5190_s4, %s3952_s24  ;;  %p3959_p1 = scmp.lt.u32.totalorder %s3952_s24, %s5190_s4 }
  0xc4   : > { %p3955_p9 = pnand %p3953_p7, %p4462_p8 }
  0xc6   : > { %p3956_p4 = pneg %p3955_p9 }
  0xc8   : > { %p3961_p3 = pnand %p3959_p1, %p3956_p4 }
  0xca   : > { %3964 = shalt.err (!%p3961_p3)
}
  0xcb   : > { %s3965_s20 = scalar_lea.vmem %s423_s16, 3072  ;;  %p3973_p13 = scmp.lt.s32.totalorder %s423_s16, %s423_s16 }
  0xcc   : > { %p3966_p10 = scmp.ne.s32.totalorder %s423_s16, %s3965_s20  ;;  %p3974_p0 = scmp.lt.s32.totalorder %s3965_s20, %s3965_s20 }
  0xce   : > { %p3968_p11 = pnand %p3966_p10, %p4462_p8  ;;  %p3975_p2 = por %p3974_p0, %p3973_p13 }
  0xd0   : > { %p3969_p12 = pneg %p3968_p11 }
  0xd2   : > { %p3976_p5 = pnand %p3975_p2, %p3969_p12 }
  0xd4   : > { %3979 = shalt.err (!%p3976_p5)
}
  0xd5   : > { %s4303_s2 = smov 192   ;;  %s4304_s26 = smov 12  }
  0xd6   : > { %3496 = dma.hbm_to_vmem [thread:$0]  (!%p4446_p6), %s5190_s4, 3072, %s423_s16, [#allocation12], %s4303_s2, %s4303_s2, %s4304_s26  }
  0xd7   : > { %s4305_s28 = smov [#allocation16]   ;;  %s5191_s6 = sld [smem:[#allocation48_spill]] }
  0xd8   : > { %s446_s22 = sshll.u32 %s4305_s28, 4  ;;  %s447_s22 = int_to_ptr.vmem [resolvable:$true] %s446_s22 }
  0xdd   : > { %s3980_s19 = scalar_lea.hbm %s5191_s6, 1024 }
  0xde   : > { %p3981_p7 = scmp.ne.s32.totalorder %s5191_s6, %s3980_s19  ;;  %p3987_p1 = scmp.lt.u32.totalorder %s3980_s19, %s5191_s6 }
  0xe0   : > { %p3983_p9 = pnand %p3981_p7, %p4462_p8 }
  0xe2   : > { %p3984_p4 = pneg %p3983_p9 }
  0xe4   : > { %p3989_p3 = pnand %p3987_p1, %p3984_p4 }
  0xe6   : > { %3992 = shalt.err (!%p3989_p3)
}
  0xe7   : > { %s3993_s16 = scalar_lea.vmem %s447_s22, 1024  ;;  %p4001_p13 = scmp.lt.s32.totalorder %s447_s22, %s447_s22 }
  0xe8   : > { %p3994_p10 = scmp.ne.s32.totalorder %s447_s22, %s3993_s16  ;;  %p4002_p0 = scmp.lt.s32.totalorder %s3993_s16, %s3993_s16 }
  0xea   : > { %p3996_p11 = pnand %p3994_p10, %p4462_p8  ;;  %p4003_p2 = por %p4002_p0, %p4001_p13 }
  0xec   : > { %p3997_p12 = pneg %p3996_p11 }
  0xee   : > { %p4004_p5 = pnand %p4003_p2, %p3997_p12 }
  0xf0   : > { %4007 = shalt.err (!%p4004_p5)
}
  0xf1   : > { %s5166_s2 = smov 64   ;;  %s5167_s26 = smov 4  }
  0xf2   : > { %3502 = dma.hbm_to_vmem [thread:$0]  (!%p4446_p6), %s5191_s6, 1024, %s447_s22, [#allocation15], %s5166_s2, %s5166_s2, %s5167_s26  }
  0xf3   : > { %s4308_s14 = smov [#allocation19]   ;;  %s4309_s24 = smov [#allocation22]  }
  0xf4   : > { %s471_s28 = sshll.u32 %s4308_s14, 4  ;;  %s492_s0 = sshll.u32 %s4309_s24, 4  ;;  %s472_s28 = int_to_ptr.vmem [resolvable:$true] %s471_s28  ;;  %s4619_s0 = int_to_ptr.vmem [resolvable:$true] %s492_s0 }
  0xf5   : > { %s5192_s8 = sld [smem:[#allocation50_spill]] }
  0xfb   : > { %s4008_s1 = scalar_lea.hbm %s5192_s8, 16 }
  0xfc   : > { %p4009_p7 = scmp.ne.s32.totalorder %s5192_s8, %s4008_s1  ;;  %p4015_p1 = scmp.lt.u32.totalorder %s4008_s1, %s5192_s8 }
  0xfe   : > { %p4011_p9 = pnand %p4009_p7, %p4462_p8 }
 0x100   : > { %p4012_p4 = pneg %p4011_p9 }
 0x102   : > { %p4017_p3 = pnand %p4015_p1, %p4012_p4 }
 0x104   : > { %4020 = shalt.err (!%p4017_p3)
}
 0x105   : > { %s4021_s21 = scalar_lea.vmem %s472_s28, 16  ;;  %s4028_s14 = scalar_lea.vmem %s472_s28, 32 }
 0x106   : > { %p4022_p10 = scmp.ne.s32.totalorder %s472_s28, %s4021_s21  ;;  %p4029_p13 = scmp.lt.s32.totalorder %s472_s28, %s472_s28 }
 0x107   : > { %p4030_p0 = scmp.lt.s32.totalorder %s4028_s14, %s4021_s21 }
 0x108   : > { %p4024_p11 = pnand %p4022_p10, %p4462_p8 }
 0x109   : > { %p4031_p2 = por %p4030_p0, %p4029_p13 }
 0x10a   : > { %p4025_p12 = pneg %p4024_p11 }
 0x10c   : > { %p4032_p5 = pnand %p4031_p2, %p4025_p12 }
 0x10e   : > { %4035 = shalt.err (!%p4032_p5)
}
 0x10f   : > { %3508 = dma.hbm_to_vmem [thread:$0]  (!%p4446_p6), %s5192_s8, 16, %s472_s28, [#allocation18]  }
 0x110   : > { %s4036_s20 = scalar_lea.hbm %s5152_s10, 4096 }
 0x111   : > { %p4037_p7 = scmp.ne.s32.totalorder %s5152_s10, %s4036_s20  ;;  %p4043_p1 = scmp.lt.u32.totalorder %s4036_s20, %s5152_s10 }
 0x113   : > { %p4039_p9 = pnand %p4037_p7, %p4462_p8 }
 0x115   : > { %p4040_p4 = pneg %p4039_p9 }
 0x117   : > { %p4045_p3 = pnand %p4043_p1, %p4040_p4 }
 0x119   : > { %4048 = shalt.err (!%p4045_p3)
}
 0x11a   : > { %s4049_s28 = scalar_lea.vmem %s4619_s0, 4096  ;;  %p4057_p13 = scmp.lt.s32.totalorder %s4619_s0, %s4619_s0 }
 0x11b   : > { %p4050_p10 = scmp.ne.s32.totalorder %s4619_s0, %s4049_s28  ;;  %p4058_p0 = scmp.lt.s32.totalorder %s4049_s28, %s4049_s28 }
 0x11d   : > { %p4052_p11 = pnand %p4050_p10, %p4462_p8  ;;  %p4059_p2 = por %p4058_p0, %p4057_p13 }
 0x11f   : > { %p4053_p12 = pneg %p4052_p11 }
 0x121   : > { %p4060_p5 = pnand %p4059_p2, %p4053_p12 }
 0x123   : > { %4063 = shalt.err (!%p4060_p5)
}
 0x124   : > { %s4310_s14 = smov 256   ;;  %s4311_s24 = smov 16  }
 0x125   : > { %3514 = dma.hbm_to_vmem [thread:$0]  (!%p4446_p6), %s5152_s10, 4096, %s4619_s0, [#allocation21], %s4310_s14, %s4310_s14, %s4311_s24  }
 0x126   : > { %s4312_s1 = smov [#allocation25]   ;;  %s4313_s16 = smov [#allocation26]  }
 0x127   : > { %s516_s20 = sshll.u32 %s4312_s1, 4  ;;  %s530_s3 = sshll.u32 %s4313_s16, 4  ;;  %s517_s20 = int_to_ptr.vmem [resolvable:$true] %s516_s20  ;;  %s4662_s3 = int_to_ptr.vmem [resolvable:$true] %s530_s3 }
 0x128   : > { %s4064_s28 = scalar_lea.hbm %s5154_s12, 4096 }
 0x129   : > { %p4065_p7 = scmp.ne.s32.totalorder %s5154_s12, %s4064_s28  ;;  %p4071_p1 = scmp.lt.u32.totalorder %s4064_s28, %s5154_s12 }
 0x12b   : > { %p4067_p9 = pnand %p4065_p7, %p4462_p8 }
 0x12d   : > { %p4068_p4 = pneg %p4067_p9 }
 0x12f   : > { %p4073_p3 = pnand %p4071_p1, %p4068_p4 }
 0x131   : > { %4076 = shalt.err (!%p4073_p3)
}
 0x132   : > { %s4077_s14 = scalar_lea.vmem %s517_s20, 4096  ;;  %p4085_p13 = scmp.lt.s32.totalorder %s517_s20, %s517_s20 }
 0x133   : > { %p4078_p10 = scmp.ne.s32.totalorder %s517_s20, %s4077_s14  ;;  %p4086_p0 = scmp.lt.s32.totalorder %s4077_s14, %s4077_s14 }
 0x135   : > { %p4080_p11 = pnand %p4078_p10, %p4462_p8  ;;  %p4087_p2 = por %p4086_p0, %p4085_p13 }
 0x137   : > { %p4081_p12 = pneg %p4080_p11 }
 0x139   : > { %p4088_p5 = pnand %p4087_p2, %p4081_p12 }
 0x13b   : > { %4091 = shalt.err (!%p4088_p5)
}
 0x13c   : > { %s5193_s2 = smov 4   ;;  %s5194_s26 = smov 64  }
 0x13d   : > { %3520 = dma.hbm_to_vmem [thread:$0]  (!%p4446_p6), %s5154_s12, 4096, %s517_s20, [#allocation24], %s5194_s26, %s5194_s26, %s5193_s2  }
 0x13e   : > { %s4092_s22 = scalar_lea.hbm %s5155_s13, 16 }
 0x13f   : > { %p4093_p7 = scmp.ne.s32.totalorder %s5155_s13, %s4092_s22  ;;  %p4099_p1 = scmp.lt.u32.totalorder %s4092_s22, %s5155_s13 }
 0x141   : > { %p4095_p9 = pnand %p4093_p7, %p4462_p8 }
 0x143   : > { %p4096_p4 = pneg %p4095_p9 }
 0x145   : > { %p4101_p3 = pnand %p4099_p1, %p4096_p4 }
 0x147   : > { %4104 = shalt.err (!%p4101_p3)
}
 0x148   : > { %s4105_s20 = scalar_lea.vmem %s4662_s3, 16  ;;  %s4112_s14 = scalar_lea.vmem %s4662_s3, 32 }
 0x149   : > { %p4106_p10 = scmp.ne.s32.totalorder %s4662_s3, %s4105_s20  ;;  %p4113_p13 = scmp.lt.s32.totalorder %s4662_s3, %s4662_s3 }
 0x14a   : > { %p4114_p0 = scmp.lt.s32.totalorder %s4112_s14, %s4105_s20 }
 0x14b   : > { %p4108_p11 = pnand %p4106_p10, %p4462_p8 }
 0x14c   : > { %p4115_p2 = por %p4114_p0, %p4113_p13 }
 0x14d   : > { %p4109_p12 = pneg %p4108_p11 }
 0x14f   : > { %p4116_p5 = pnand %p4115_p2, %p4109_p12 }
 0x151   : > { %4119 = shalt.err (!%p4116_p5)
}
 0x152   : > { %s5195_s23 = sld [smem:[#allocation40_spill]]  ;;  %s3112_s24 = sadd.s32 4294967294, %s4294_s18  }
 0x153   : > { %3523 = dma.hbm_to_vmem [thread:$0]  (!%p4446_p6), %s5155_s13, 16, %s4662_s3, [#allocation27]  }
 0x154   : > { %s51_s27 = sadd.s32 1, %s4290_s17  ;;  %s58_s25 = sadd.s32 1, %s4282_s15 }
 0x155   : > { %p53_p8 = scmp.ge.s32.totalorder %s51_s27, 2  ;;  %p65_p7 = scmp.ne.s32.totalorder %s4282_s15, %s4278_s30 }
 0x156   : > { %p66_p9 = scmp.eq.s32.totalorder %s4294_s18, 0  ;;  %p71_p1 = scmp.ne.s32.totalorder %s4278_s30, %s4274_s29 }
 0x157   : > { %s5234_s27 = smov (%p53_p8, %s51_s27), 0  ;;  %p381_p13 = scmp.eq.s32.totalorder %s3112_s24, 1 }
 0x158   : > { %p4717_p4 = por %p66_p9, %p65_p7  ;;  %s55_s3 = ssub.s32 %s4290_s17, %s5234_s27 }
 0x159   : > { %p375_p6 = scmp.eq.s32.totalorder %s5195_s23, 1  ;;  %p56_p3 = scmp.eq.s32.totalorder %s55_s3, 0 }
 0x15a   : > { %p5197_p10 = scmp.eq.s32.totalorder %s5195_s23, 0  ;;  %p4739_p0 = por %p381_p13, %p71_p1 }
 0x15b   : > { %p4732_p12 = por %p375_p6, %p65_p7  ;;  %p3547_p2 = scmp.lt.s32.totalorder %s4294_s18, 2 }
 0x15c   : > { %p4728_p11 = por %p5197_p10, %p71_p1  ;;  %s4745_s19 = sand.u32 1, %s4282_s15  }
 0x15d   : > { %s5199_s22 = scalar_select %p4732_p12, 1, 0 }
 0x15e   : > { %s5198_s16 = scalar_select %p4728_p11, 1, 0 }
 0x15f   : > { %s4737_s21 = scalar_select %p56_p3, %s4282_s15, %s58_s25  }
 0x160   : > { %s5200_s28 = scalar_select %p4739_p0, 1, 0 }
 0x161   : > { %s3128_s0 = sshll.u32 %s4290_s17, 7  ;;  %s3127_s20 = sshll.u32 %s4745_s19, 3 }
 0x162   : > { %s5201_s26 = sld [smem:[#allocation42_spill]]  ;;  %s545_s24 = scalar_lea.vmem [#allocation5], %s3127_s20 }
 0x163   : > { %s552_s25 = sshll.u32 %s545_s24, 4  ;;  %p4756_p5 = pnand %p3547_p2, %p4717_p4  ;;  %s4760_s25 = int_to_ptr.vmem [resolvable:$true] %s552_s25 }
 0x164   : > { %s542_s5 = scalar_lea.sflag [#allocation6], %s4745_s19 }
 0x165   : > { %p4122_p7 = pneg %p4756_p5 }
 0x168   : > { %s4752_s23 = scalar_lea.hbm %s5201_s26, %s3128_s0  ;;  %s4125_s20 = scalar_lea.hbm %s5201_s26, 256 }
 0x169   : > { %s4120_s14 = scalar_lea.hbm %s4752_s23, 128  ;;  %p4126_p4 = scmp.lt.u32.totalorder %s4752_s23, %s5201_s26 }
 0x16a   : > { %p4121_p8 = scmp.ne.s32.totalorder %s4752_s23, %s4120_s14  ;;  %p4127_p6 = scmp.lt.u32.totalorder %s4125_s20, %s4120_s14 }
 0x16b   : > { %p4129_p10 = scmp.lt.u32.totalorder %s4120_s14, %s4752_s23 }
 0x16c   : > { %p4123_p9 = pnand %p4122_p7, %p4121_p8  ;;  %p4128_p3 = por %p4127_p6, %p4126_p4 }
 0x16e   : > { %p4124_p1 = pneg %p4123_p9  ;;  %p4130_p13 = por %p4129_p10, %p4128_p3 }
 0x170   : > { %p4131_p2 = pnand %p4130_p13, %p4124_p1 }
 0x172   : > { %4134 = shalt.err (!%p4131_p2)
}
 0x173   : > { %s4135_s4 = scalar_lea.vmem %s4760_s25, 128  ;;  %s4314_s0 = smov [#allocation5]  }
 0x174   : > { %p4136_p8 = scmp.ne.s32.totalorder %s4760_s25, %s4135_s4  ;;  %s4140_s1 = sshll.u32 %s4314_s0, 4  ;;  %s4141_s1 = int_to_ptr.vmem [resolvable:$false] %s4140_s1 }
 0x175   : > { %s4142_s2 = scalar_lea.vmem %s4141_s1, 256  ;;  %p4143_p12 = scmp.lt.s32.totalorder %s4760_s25, %s4141_s1 }
 0x176   : > { %p4138_p9 = pnand %p4136_p8, %p4122_p7  ;;  %p4144_p4 = scmp.lt.s32.totalorder %s4142_s2, %s4135_s4 }
 0x178   : > { %p4139_p0 = pneg %p4138_p9  ;;  %p4145_p6 = por %p4144_p4, %p4143_p12 }
 0x17a   : > { %p4146_p3 = pnand %p4145_p6, %p4139_p0 }
 0x17c   : > { %4149 = shalt.err (!%p4146_p3)
}
 0x17d   : > { %3527 = dma.hbm_to_vmem [thread:$0]  (!%p4756_p5), %s4752_s23, 128, %s4760_s25, %s542_s5  }
 0x17e   : > { %s3129_s14 = sshll.u32 %s4290_s17, 4  ;;  %s5203_s0 = sld [smem:[#allocation43_spill]] }
 0x17f   : > { %s562_s4 = scalar_lea.vmem [#allocation8], %s4745_s19  ;;  %s5204_s2 = sand.u32 1, %s4294_s18  }
 0x180   : > { %s569_s1 = sshll.u32 %s562_s4, 4  ;;  %s560_s7 = scalar_lea.sflag [#allocation9], %s5204_s2  ;;  %s570_s1 = int_to_ptr.vmem [resolvable:$true] %s569_s1 }
 0x184   : > { %s4793_s6 = scalar_lea.hbm %s5203_s0, %s3129_s14  ;;  %s4155_s25 = scalar_lea.hbm %s5203_s0, 32 }
 0x185   : > { %s4150_s8 = scalar_lea.hbm %s4793_s6, 16  ;;  %p4156_p10 = scmp.lt.u32.totalorder %s4793_s6, %s5203_s0 }
 0x186   : > { %p4151_p12 = scmp.ne.s32.totalorder %s4793_s6, %s4150_s8  ;;  %p4157_p13 = scmp.lt.u32.totalorder %s4155_s25, %s4150_s8 }
 0x187   : > { %p4159_p8 = scmp.lt.u32.totalorder %s4150_s8, %s4793_s6 }
 0x188   : > { %p4153_p0 = pnand %p4151_p12, %p4122_p7  ;;  %p4158_p2 = por %p4157_p13, %p4156_p10 }
 0x18a   : > { %p4154_p1 = pneg %p4153_p0  ;;  %p4160_p9 = por %p4159_p8, %p4158_p2 }
 0x18c   : > { %p4161_p4 = pnand %p4160_p9, %p4154_p1 }
 0x18e   : > { %4164 = shalt.err (!%p4161_p4)
}
 0x18f   : > { %s4165_s19 = scalar_lea.vmem %s570_s1, 16  ;;  %s4315_s24 = smov [#allocation8]  }
 0x190   : > { %p4166_p6 = scmp.ne.s32.totalorder %s570_s1, %s4165_s19  ;;  %s4170_s4 = sshll.u32 %s4315_s24, 4  ;;  %s4171_s4 = int_to_ptr.vmem [resolvable:$false] %s4170_s4 }
 0x191   : > { %s4172_s2 = scalar_lea.vmem %s4171_s4, 32  ;;  %p4173_p0 = scmp.lt.s32.totalorder %s570_s1, %s4171_s4 }
 0x192   : > { %p4168_p3 = pnand %p4166_p6, %p4122_p7  ;;  %p4174_p11 = scmp.lt.s32.totalorder %s4172_s2, %s4165_s19 }
 0x194   : > { %p4169_p12 = pneg %p4168_p3  ;;  %p4175_p10 = por %p4174_p11, %p4173_p0 }
 0x196   : > { %p4176_p13 = pnand %p4175_p10, %p4169_p12 }
 0x198   : > { %4179 = shalt.err (!%p4176_p13)
}
 0x199   : > { %3530 = dma.hbm_to_vmem [thread:$0]  (!%p4756_p5), %s4793_s6, 16, %s570_s1, %s560_s7  }
 0x19a   : > { %s5205_s8 = sld [smem:[#allocation41_spill]] }
 0x1a0   : > { %p5206_p1 = scmp.ne.s32.totalorder %s5205_s8, 0 }
 0x1a1   : > { %s4820_s5 = sand.u32 (!%p5206_p1), 1, %s4278_s30   ;;  %p5207_p11 = scmp.ne.s32.totalorder (!%p5206_p1), %s5198_s16, 0 }
 0x1a2   : > { %578 = sbr.rel (%p5206_p1) target bundleno = 3063 (0xbf7), region = 76  ;;  %s3131_s23 = sshll.u32 (!%p5206_p1), %s4820_s5, 3 }
 0x1a3   : > { %s581_s25 = scalar_lea.sflag (!%p5206_p1), [#allocation6], %s4820_s5  ;;  %s4826_s14 = scalar_lea.vmem (!%p5206_p1), [#allocation5], %s3131_s23 }
 0x1a9   : > { %4233 = dma.done.wait (%p5207_p11), %s581_s25, 128  }
 0x1aa   : > { %4235 = vsyncadd (%p5207_p11), %s581_s25, 4294967168  ;;  %s5208_s6 = sld [smem:[#allocation40_spill]]  ;;  %s592_s1 = scalar_lea.vmem [#allocation8], %s4820_s5 }
 0x1b0   : > { %s589_s7 = sand.u32 1, %s5208_s6  }
 0x1b1   : > { %s590_s3 = scalar_lea.sflag [#allocation9], %s589_s7 }
 0x1b2   : > { %4237 = dma.done.wait (%p5207_p11), %s590_s3, 16  }
 0x1b3   : > { %4239 = vsyncadd (%p5207_p11), %s590_s3, 4294967280  ;;  %p5209_p5 = scmp.eq.s32.totalorder %s5208_s6, 0 }
 0x1b5   : > { %4241 = dma.done.wait (%p5209_p5), [#allocation9], 16   ;;  %p5210_p7 = pmov %p5209_p5 }
 0x1b6   : > { %p5211_p2 = pmov %p5209_p5 }
 0x1b7   : > { %4243 = vsyncadd (%p5210_p7), [#allocation9], 4294967280 }
 0x1b8   : > { %4245 = dma.done.wait (%p5211_p2), [#allocation12], 3088   ;;  %p5212_p8 = pmov %p5211_p2 }
 0x1b9   : > { %p5213_p9 = pmov %p5211_p2 }
 0x1ba   : > { %4247 = vsyncadd (%p5212_p8), [#allocation12], 4294964208 }
 0x1bb   : > { %4249 = dma.done.wait (%p5213_p9), [#allocation15], 1072   ;;  %p5214_p4 = pmov %p5211_p2 }
 0x1bc   : > { %p5215_p6 = pmov %p5211_p2 }
 0x1bd   : > { %4251 = vsyncadd (%p5214_p4), [#allocation15], 4294966224 }
 0x1be   : > { %4253 = dma.done.wait (%p5215_p6), [#allocation18], 32   ;;  %p5216_p3 = pmov %p5211_p2 }
 0x1bf   : > { %p5217_p12 = pmov %p5211_p2 }
 0x1c0   : > { %4255 = vsyncadd (%p5216_p3), [#allocation18], 4294967264 }
 0x1c1   : > { %4257 = dma.done.wait (%p5217_p12), [#allocation21], 4112   ;;  %p5218_p0 = pmov %p5211_p2 }
 0x1c3   : > { %4259 = vsyncadd (%p5218_p0), [#allocation21], 4294963184  ;;  %p5219_p10 = pmov %p5218_p0 }
 0x1c4   : > { %p5220_p13 = pmov %p5218_p0 }
 0x1c5   : > { %4261 = dma.done.wait (%p5219_p10), [#allocation24], 4160  }
 0x1c6   : > { %4263 = vsyncadd (%p5220_p13), [#allocation24], 4294963136  ;;  %p5221_p1 = pmov %p5218_p0 }
 0x1c7   : > { %p5222_p11 = pmov %p5218_p0 }
 0x1c8   : > { %4265 = dma.done.wait (%p5221_p1), [#allocation27], 16  }
 0x1c9   : > { %4267 = vsyncadd (%p5222_p11), [#allocation27], 4294967280  ;;  %v694_v0 = vld [vmem:[%s4826_s14] sm:$0xff]  ;;  %v4316_v3 = vmov 0.0   ;;  %v4317_v25 = vmov 0   ;;  %vm4318_vm0 = vmmov 0   ;;  %v758_v41 = vlaneseq }
 0x1ca   : > { %697 = vadd.xlane.f32.xlu0 %v694_v0  ;;  %v3636_v1 = vld [vmem:[#allocation13 + $0x4] ss:$12 sps:$4 sm:$0xff]   ;;  %v3638_v2 = vld [vmem:[#allocation13] ss:$12 sps:$4 sm:$0xff]   ;;  %3345 = vmatprep.subr.bf16.mxu1 %v4316_v3  ;;  %v3639_v4 = vld [vmem:[#allocation13 + $0x8] ss:$12 sps:$4 sm:$0xff]  }
 0x1cb   : > { %v3640_v5 = vld [vmem:[#allocation13 + $0x1c] ss:$12 sps:$4 sm:$0xff]   ;;  %v3642_v6 = vld [vmem:[#allocation13 + $0x18] ss:$12 sps:$4 sm:$0xff]   ;;  %901 = vmatprep.subr.bf16.mxu0 %v3636_v1  ;;  %v3643_v7 = vld [vmem:[#allocation13 + $0x20] ss:$12 sps:$4 sm:$0xff]   ;;  %3346 = vmatpush3.bf16.msra.mxu1 %v3639_v4 }
 0x1cc   : > { %v3644_v8 = vld [vmem:[#allocation13 + $0x34] ss:$12 sps:$4 sm:$0xff]   ;;  %902 = vmatpush1.bf16.msra.mxu0 %v3638_v2  ;;  %3347 = vmatprep.subr.bf16.mxu1 %v4316_v3  ;;  %v3646_v13 = vld [vmem:[#allocation13 + $0x30] ss:$12 sps:$4 sm:$0xff]   ;;  %v3647_v14 = vld [vmem:[#allocation13 + $0x38] ss:$12 sps:$4 sm:$0xff]  }
 0x1cd   : > { %903 = vmatprep.subr.bf16.mxu0 %v3640_v5  ;;  %v3648_v15 = vld [vmem:[#allocation13 + $0x4c] ss:$12 sps:$4 sm:$0xff]   ;;  %v3650_v16 = vld [vmem:[#allocation13 + $0x48] ss:$12 sps:$4 sm:$0xff]   ;;  %v3651_v17 = vld [vmem:[#allocation13 + $0x50] ss:$12 sps:$4 sm:$0xff]   ;;  %933 = vmatprep.mubr.bf16.mxu0 %v4317_v25 }
 0x1ce   : > { %v3652_v18 = vld [vmem:[#allocation13 + $0x64] ss:$12 sps:$4 sm:$0xff]   ;;  %v3654_v19 = vld [vmem:[#allocation13 + $0x60] ss:$12 sps:$4 sm:$0xff]   ;;  %v3655_v20 = vld [vmem:[#allocation13 + $0x68] ss:$12 sps:$4 sm:$0xff]   ;;  %3361 = vmatprep.mubr.msk.bf16.mxu1 %vm4318_vm0, %v4316_v3 }
 0x1cf   : > { %3348 = vmatpush3.bf16.msra.mxu1 %v3643_v7  ;;  %v3656_v21 = vld [vmem:[#allocation13 + $0x7c] ss:$12 sps:$4 sm:$0xff]   ;;  %v3658_v22 = vld [vmem:[#allocation13 + $0x78] ss:$12 sps:$4 sm:$0xff]   ;;  %v3659_v23 = vld [vmem:[#allocation13 + $0x80] ss:$12 sps:$4 sm:$0xff]  }
 0x1d0   : > { %904 = vmatpush1.bf16.msra.mxu0 %v3642_v6  ;;  %3349 = vmatprep.subr.bf16.mxu1 %v4316_v3  ;;  %v3660_v24 = vld [vmem:[#allocation13 + $0x94] ss:$12 sps:$4 sm:$0xff]   ;;  %v3662_v26 = vld [vmem:[#allocation13 + $0x90] ss:$12 sps:$4 sm:$0xff]   ;;  %v3663_v27 = vld [vmem:[#allocation13 + $0x98] ss:$12 sps:$4 sm:$0xff]  }
 0x1d1   : > { %905 = vmatprep.subr.bf16.mxu0 %v3644_v8  ;;  %v3664_v28 = vld [vmem:[#allocation13 + $0xac] ss:$12 sps:$4 sm:$0xff]   ;;  %v3666_v29 = vld [vmem:[#allocation13 + $0xa8] ss:$12 sps:$4 sm:$0xff]   ;;  %v3667_v30 = vld [vmem:[#allocation13 + $0xb0] ss:$12 sps:$4 sm:$0xff]  }
 0x1d2   : > { %v3145_v35 = vld [vmem:[#allocation10] ss:$0 sm:$0xff]  ;;  %v3146_v37 = vld [vmem:[#allocation11] ss:$0 sm:$0xff]  ;;  %v4885_v42 = vshrl.u32 %v758_v41, 7  ;;  %s4319_s16 = smov 32  }
 0x1d3   : > { %3350 = vmatpush3.bf16.msra.mxu1 %v3647_v14  ;;  %v4888_v44 = vld [vmem:[#allocation14] sm:$0x7]  ;;  %s4320_s20 = smov 96   ;;  %s4321_s19 = smov 64   ;;  %v4322_v59 = vmov 1983009808  }
 0x1d4   : > { %906 = vmatpush1.bf16.msra.mxu0 %v3646_v13  ;;  %3351 = vmatprep.subr.bf16.mxu1 %v4316_v3  ;;  %v764_v43 = vsub.s32 1, %v4885_v42  ;;  %v4891_v45 = vsub.s32 0, %v4885_v42  ;;  %v996_v60 = vunpack.c.l.s4 %v4322_v59  ;;  %v4323_v61 = vmov 1934713408   ;;  %s5223_s24 = sld [smem:[#allocation39_spill]]  ;;  %s688_s2 = scalar_lea.vmem [#allocation28], %s3131_s23 }
 0x1d5   : > { %907 = vmatprep.subr.bf16.mxu0 %v3648_v15  ;;  %v1028_v62 = vunpack.c.l.s4 %v4323_v61  ;;  %vm1289_vm1 = vcmask 257024   ;;  %vm1479_vm2 = vcmask 261120   ;;  %vm1664_vm4 = vcmask 64512   ;;  %s2894_s8 = sshll.u32 %s688_s2, 4  ;;  %s5224_s6 = sld [smem:[#allocation51_spill]]  ;;  %s5095_s8 = int_to_ptr.vmem [resolvable:$true] %s2894_s8 }
 0x1d6   : > { %v765_v46 = vrot.slane %v4888_v44, %v764_v43  ;;  %v761_v51 = vrot.slane %v4888_v44, %v4891_v45  ;;  %v997_v63 = vunpack.c.0.s8 %v996_v60  ;;  %vm1720_vm5 = vcmask 1043456   ;;  %s2880_s3 = scalar_lea.sflag [#allocation7], %s4820_s5  ;;  %p5225_p7 = scmp.ne.s32.totalorder %s5199_s22, 0 }
 0x1d7   : > { %3352 = vmatpush3.bf16.msra.mxu1 %v3651_v17  ;;  %v1029_v2 = vunpack.c.0.s8 %v1028_v62  ;;  %vm2051_vm6 = vcmask 523264   ;;  %vm2053_vm7 = vcmask 785408   ;;  %s4325_s23 = smov [#allocation28]  }
 0x1d8   : > { %908 = vmatpush1.bf16.msra.mxu0 %v3650_v16  ;;  %3353 = vmatprep.subr.bf16.mxu1 %v4316_v3  ;;  %v4907_v4 = vsub.s32 %v997_v63, %v4885_v42 }
 0x1d9   : > { %909 = vmatprep.subr.bf16.mxu0 %v3652_v18 }
 0x1da   : > { %s3264_s4 = sshll.u32 %s5223_s24, 7 }
 0x1db   : > { %3354 = vmatpush3.bf16.msra.mxu1 %v3655_v20  ;;  %s5093_s7 = scalar_lea.hbm %s5224_s6, %s3264_s4 }
 0x1dc   : > { %910 = vmatpush1.bf16.msra.mxu0 %v3654_v19  ;;  %3355 = vmatprep.subr.bf16.mxu1 %v4316_v3 }
 0x1dd   : > { %911 = vmatprep.subr.bf16.mxu0 %v3656_v21 }
 0x1df   : > { %3356 = vmatpush3.bf16.msra.mxu1 %v3659_v23 }
 0x1e0   : > { %912 = vmatpush1.bf16.msra.mxu0 %v3658_v22  ;;  %3357 = vmatprep.subr.bf16.mxu1 %v4316_v3 }
 0x1e1   : > { %913 = vmatprep.subr.bf16.mxu0 %v3660_v24 }
 0x1e3   : > { %3358 = vmatpush3.bf16.msra.mxu1 %v3663_v27 }
 0x1e4   : > { %914 = vmatpush1.bf16.msra.mxu0 %v3662_v26  ;;  %3359 = vmatprep.subr.bf16.mxu1 %v4316_v3 }
 0x1e5   : > { %915 = vmatprep.subr.bf16.mxu0 %v3664_v28 }
 0x1e7   : > { %3360 = vmatpush3.bf16.msra.mxu1 %v3667_v30 }
 0x1e8   : > { %916 = vmatpush1.bf16.msra.mxu0 %v3666_v29  ;;  %3365 = vmatprep.subr.bf16.mxu1 %v4316_v3 }
 0x1e9   : > { %3389 = vmatprep.subr.bf16.mxu0 %v4316_v3 }
 0x257   : > { %v698_v9 = vpop.xlane.xlu0 %697 }
 0x258   : > { %v700_v10 = vmul.f32 0.0078125, %v698_v9 }
 0x25a   : > { %v701_v11 = vsub.f32 %v694_v0, %v700_v10  ;;  %v4910_v10 = vsub.s32 %v1029_v2, %v4885_v42 }
 0x25c   : > { %v702_v12 = vmul.f32 %v701_v11, %v701_v11 }
 0x25e   : > { %703 = vadd.xlane.f32.xlu0 %v702_v12 }
 0x2eb   : > { %v704_v31 = vpop.xlane.xlu0 %703 }
 0x2ec   : > { %v705_v32 = vmul.f32 0.0078125, %v704_v31 }
 0x2ee   : > { %v706_v33 = vadd.f32 1e-05, %v705_v32 }
 0x2f0   : > { %3756 = vrsqrt.f32 %v706_v33 }
 0x2fa   : > { %v3757_v34 = vpop.eup %3756 }
 0x2fb   : > { %v708_v36 = vmul.f32 %v3757_v34, %v701_v11 }
 0x2fd   : > { %v715_v38 = vmul.f32 %v3145_v35, %v708_v36 }
 0x2ff   : > { %v722_v39 = vadd.f32 %v3146_v37, %v715_v38 }
 0x301   : > { %v723_v40 = vpack.c.bf16 %v722_v39, %v722_v39 }
 0x303   : > { %934 = vmatmul.mubr.bf16.vlgmr.msra.gmra.mrb[0].mxu0 %v723_v40  ;;  %3362 = vmatmul.mubr.bf16.vlgmr.msra.gmra.mrb[0].mxu1 %v723_v40 }
 0x304   : > { %3367 = vmatprep.mubr.msk.bf16.mxu1 %vm4318_vm0, %v4316_v3  ;;  %3391 = vmatprep.mubr.msk.bf16.mxu0 %vm4318_vm0, %v4316_v3 }
 0x3d6   : > { %v935_v47 = vpop.f32.mrb[0].mxu0  ;;  %v4896_v48 = vpop.f32.mrb[0].mxu1 }
 0x3d7   : > { %v937_v49 = vpop.f32.mrb[1].mxu0  ;;  %v3363_v50 = vpop.f32.mrb[1].mxu1  ;;  %v936_v57 = vadd.f32 %v935_v47, %v761_v51 }
 0x3d8   : > { %v938_v52 = vadd.f32 %v937_v49, %v765_v46  ;;  %v939_v53 = vpop.f32.mrb[2].mxu0  ;;  %v979_v54 = vpop.f32.mrb[2].mxu1 }
 0x3d9   : > { %v940_v55 = vpop.f32.mrb[3].mxu0  ;;  %v3364_v56 = vpop.f32.mrb[3].mxu1  ;;  %v982_v58 = vmul.f32 0.17677669, %v936_v57 }
 0x3da   : > { %1068 = vrot.lane.b32.xlu0 %v938_v52, %s4319_s16  ;;  %1062 = vrot.lane.b32.xlu1 %v938_v52, %s4320_s20 }
 0x3de   : > { %1065 = vrot.lane.b32.xlu1 %v938_v52, %s4321_s19 }
 0x3e2   : > { %984 = vrot.lane.b32.xlu1 %v982_v58, %s4320_s20 }
 0x3e6   : > { %987 = vrot.lane.b32.xlu1 %v982_v58, %s4321_s19 }
 0x3ea   : > { %990 = vrot.lane.b32.xlu1 %v982_v58, %s4319_s16 }
 0x44c   : > { %v1069_v0 = vpop.permute.xlu0 %1068  ;;  %v1063_v1 = vpop.permute.xlu1 %1062 }
 0x44d   : > { %v1087_v5 = vcombine.low %v1063_v1, %v1069_v0  ;;  %v1088_v6 = vcombine.high %v1063_v1, %v1069_v0 }
 0x44f   : > { %v1095_v11 = vrot.slane %v1087_v5, %v4907_v4  ;;  %v1102_v12 = vrot.slane %v1088_v6, %v4907_v4 }
 0x450   : > { %v1066_v7 = vpop.permute.xlu1 %1065 }
 0x451   : > { %v1071_v8 = vcombine.low %v938_v52, %v1066_v7  ;;  %v1072_v9 = vcombine.high %v938_v52, %v1066_v7 }
 0x453   : > { %v1079_v13 = vrot.slane %v1071_v8, %v4907_v4  ;;  %v1086_v14 = vrot.slane %v1072_v9, %v4907_v4 }
 0x454   : > { %v985_v15 = vpop.permute.xlu1 %984 }
 0x455   : > { %v1103_v16 = vcombine.low %v1079_v13, %v1095_v11  ;;  %v1104_v17 = vcombine.high %v1079_v13, %v1095_v11  ;;  %v1119_v18 = vcombine.low %v1086_v14, %v1102_v12  ;;  %v1120_v19 = vcombine.high %v1086_v14, %v1102_v12 }
 0x457   : > { %v1111_v20 = vrot.slane %v1103_v16, %v4910_v10  ;;  %v1118_v21 = vrot.slane %v1104_v17, %v4910_v10  ;;  %v1127_v22 = vrot.slane %v1119_v18, %v4910_v10  ;;  %v1134_v23 = vrot.slane %v1120_v19, %v4910_v10 }
 0x458   : > { %v988_v24 = vpop.permute.xlu1 %987 }
 0x459   : > { %v1294_v26 = vcombine.low %v1111_v20, %v1118_v21  ;;  %v3173_v27 = vcombine.high %v1111_v20, %v1118_v21  ;;  %v1310_v28 = vcombine.low %v1127_v22, %v1134_v23  ;;  %v3174_v29 = vcombine.high %v1127_v22, %v1134_v23 }
 0x45a   : > { %v993_v34 = vcombine.low %v982_v58, %v988_v24  ;;  %v994_v35 = vcombine.high %v982_v58, %v988_v24 }
 0x45b   : > { %v1301_v30 = vrot.slane %v1294_v26, %v4907_v4  ;;  %v1309_v31 = vrot.slane %v3173_v27, %v4907_v4  ;;  %v1317_v32 = vrot.slane %v1310_v28, %v4907_v4  ;;  %v1325_v33 = vrot.slane %v3174_v29, %v4907_v4 }
 0x45c   : > { %v991_v36 = vpop.permute.xlu1 %990  ;;  %v1001_v53 = vrot.slane %v993_v34, %v4907_v4  ;;  %v1008_v54 = vrot.slane %v994_v35, %v4907_v4 }
 0x45d   : > { %v1326_v37 = vcombine.low %v1301_v30, %v1309_v31  ;;  %v1327_v38 = vcombine.high %v1301_v30, %v1309_v31  ;;  %v1342_v39 = vcombine.low %v1317_v32, %v1325_v33  ;;  %v1343_v40 = vcombine.high %v1317_v32, %v1325_v33 }
 0x45e   : > { %v1009_v46 = vcombine.low %v985_v15, %v991_v36  ;;  %v1010_v47 = vcombine.high %v985_v15, %v991_v36 }
 0x45f   : > { %v1334_v49 = vrot.slane %v1326_v37, %v4910_v10  ;;  %v1341_v50 = vrot.slane %v1327_v38, %v4910_v10  ;;  %v1350_v51 = vrot.slane %v1342_v39, %v4910_v10  ;;  %v1357_v52 = vrot.slane %v1343_v40, %v4910_v10 }
 0x460   : > { %v1017_v55 = vrot.slane %v1009_v46, %v4907_v4  ;;  %v1024_v56 = vrot.slane %v1010_v47, %v4907_v4 }
 0x461   : > { %v1358_v57 = vcombine.low %v1334_v49, %v1350_v51  ;;  %v1359_v58 = vcombine.high %v1334_v49, %v1350_v51  ;;  %v1360_v59 = vcombine.low %v1341_v50, %v1357_v52  ;;  %v1361_v60 = vcombine.high %v1341_v50, %v1357_v52 }
 0x462   : > { %v1025_v61 = vcombine.low %v1001_v53, %v1017_v55  ;;  %v1026_v62 = vcombine.high %v1001_v53, %v1017_v55  ;;  %v1041_v63 = vcombine.low %v1008_v54, %v1024_v56  ;;  %v1042_v0 = vcombine.high %v1008_v54, %v1024_v56  ;;  %v1465_v55 = vld [vmem:[%s592_s1] sm:$0x1]  ;;  %s4180_s1 = scalar_lea.vmem %s5095_s8, 128 }
 0x463   : > { %v1362_v1 = vpack.c.bf16 %v1358_v57, %v1358_v57  ;;  %v1363_v2 = vpack.c.bf16 %v1359_v58, %v1359_v58  ;;  %v1364_v5 = vpack.c.bf16 %v1360_v59, %v1360_v59  ;;  %v1365_v6 = vpack.c.bf16 %v1361_v60, %v1361_v60  ;;  %p4181_p5 = scmp.ne.s32.totalorder %s5095_s8, %s4180_s1 }
 0x464   : > { %v1033_v7 = vrot.slane %v1025_v61, %v4910_v10  ;;  %v1040_v8 = vrot.slane %v1026_v62, %v4910_v10  ;;  %v1049_v9 = vrot.slane %v1041_v63, %v4910_v10  ;;  %v1056_v11 = vrot.slane %v1042_v0, %v4910_v10 }
 0x465   : > { %1366 = vst.msk [vmem:[#allocation3] sm:$0xf] %vm1289_vm1, %v1362_v1  ;;  %1367 = vst.msk [vmem:[#allocation3 + $0x4] sm:$0xf] %vm1289_vm1, %v1363_v2  ;;  %v1466_v56 = vsub.f32 1.0, %v1465_v55  ;;  %v1462_v57 = vand.u32 127, %v758_v41  ;;  %p4182_p2 = pnand %p4181_p5, %p5225_p7 }
 0x466   : > { %1368 = vst.msk [vmem:[#allocation3 + $0x8] sm:$0xf] %vm1289_vm1, %v1364_v5  ;;  %1369 = vst.msk [vmem:[#allocation3 + $0xc] sm:$0xf] %vm1289_vm1, %v1365_v6  ;;  %v1217_v12 = vcombine.low %v1033_v7, %v1040_v8  ;;  %v3171_v13 = vcombine.high %v1033_v7, %v1040_v8  ;;  %v1233_v14 = vcombine.low %v1049_v9, %v1056_v11  ;;  %v4324_v60 = vmov -1e+09  }
 0x467   : > { %v3172_v15 = vcombine.high %v1049_v9, %v1056_v11  ;;  %v1467_v58 = vmul.f32 -1e+09, %v1466_v56  ;;  %vm1463_vm3 = vcmp.le.s32.totalorder %v1462_v57, %v4885_v42  ;;  %p4183_p8 = pneg %p4182_p2 }
 0x468   : > { %v1224_v16 = vrot.slane %v1217_v12, %v4907_v4  ;;  %v1232_v17 = vrot.slane %v3171_v13, %v4907_v4  ;;  %v1240_v18 = vrot.slane %v1233_v14, %v4907_v4  ;;  %v1464_v61 = vsel %vm1463_vm3, 0.0, %v4324_v60 }
 0x469   : > { %v1248_v19 = vrot.slane %v3172_v15, %v4907_v4  ;;  %v1472_v59 = vrot.slane %v1467_v58, %v4891_v45 }
 0x46a   : > { %v1249_v20 = vcombine.low %v1224_v16, %v1232_v17  ;;  %v1250_v21 = vcombine.high %v1224_v16, %v1232_v17 }
 0x46b   : > { %v1265_v22 = vcombine.low %v1240_v18, %v1248_v19  ;;  %v1266_v23 = vcombine.high %v1240_v18, %v1248_v19  ;;  %v1474_v62 = vadd.f32 %v1472_v59, %v1464_v61  ;;  %v768_v19 = vsub.s32 2, %v4885_v42 }
 0x46c   : > { %v1257_v24 = vrot.slane %v1249_v20, %v4910_v10  ;;  %v1264_v26 = vrot.slane %v1250_v21, %v4910_v10  ;;  %v1475_v29 = vld [vmem:[#allocation3] sm:$0xf]  ;;  %v1476_v39 = vld [vmem:[#allocation3 + $0x4] sm:$0xf] }
 0x46d   : > { %v1273_v27 = vrot.slane %v1265_v22, %v4910_v10  ;;  %v1280_v28 = vrot.slane %v1266_v23, %v4910_v10  ;;  %v1484_v30 = vsel %vm1479_vm2, %v1475_v29, 0  ;;  %v1530_v46 = vsel %vm1479_vm2, %v1476_v39, 0  ;;  %v1477_v47 = vld [vmem:[#allocation3 + $0x8] sm:$0xf]  ;;  %v1478_v51 = vld [vmem:[#allocation3 + $0xc] sm:$0xf] }
 0x46e   : > { %3366 = vmatpush3.bf16.xpose.msra.mxu1 %v1484_v30  ;;  %v1576_v50 = vsel %vm1479_vm2, %v1477_v47, 0  ;;  %v1622_v53 = vsel %vm1479_vm2, %v1478_v51, 0 }
 0x46f   : > { %v1281_v31 = vcombine.low %v1257_v24, %v1273_v27  ;;  %v1282_v32 = vcombine.high %v1257_v24, %v1273_v27  ;;  %v1283_v33 = vcombine.low %v1264_v26, %v1280_v28  ;;  %v1284_v34 = vcombine.high %v1264_v26, %v1280_v28  ;;  %3371 = vmatprep.subr.bf16.mxu1 %v4316_v3 }
 0x470   : > { %v769_v27 = vrot.slane %v4888_v44, %v768_v19 }
 0x471   : > { %v1285_v35 = vpack.c.bf16 %v1281_v31, %v1281_v31  ;;  %v1286_v36 = vpack.c.bf16 %v1282_v32, %v1282_v32  ;;  %v1287_v37 = vpack.c.bf16 %v1283_v33, %v1283_v33  ;;  %v1288_v38 = vpack.c.bf16 %v1284_v34, %v1284_v34 }
 0x472   : > { %v977_v28 = vadd.f32 %v4896_v48, %v769_v27 }
 0x473   : > { %1290 = vst.msk [vmem:[#allocation2] sm:$0xf] %vm1289_vm1, %v1285_v35  ;;  %1291 = vst.msk [vmem:[#allocation2 + $0x4] sm:$0xf] %vm1289_vm1, %v1286_v36 }
 0x474   : > { %1292 = vst.msk [vmem:[#allocation2 + $0x8] sm:$0xf] %vm1289_vm1, %v1287_v37  ;;  %1293 = vst.msk [vmem:[#allocation2 + $0xc] sm:$0xf] %vm1289_vm1, %v1288_v38 }
 0x47a   : > { %v1453_v40 = vld [vmem:[#allocation2] sm:$0xf]  ;;  %v1454_v49 = vld [vmem:[#allocation2 + $0x4] sm:$0xf] }
 0x47b   : > { %3368 = vmatmul.mubr.msk.bf16.vlgmr.msra.gmra.mrb[4].mxu1 %vm1479_vm2, %v1453_v40  ;;  %v1455_v52 = vld [vmem:[#allocation2 + $0x8] sm:$0xf]  ;;  %v1456_v54 = vld [vmem:[#allocation2 + $0xc] sm:$0xf] }
 0x47c   : > { %3372 = vmatpush3.bf16.xpose.msra.mxu1 %v1530_v46  ;;  %3373 = vmatprep.mubr.msk.bf16.mxu1 %vm4318_vm0, %v4316_v3 }
 0x47d   : > { %3377 = vmatprep.subr.bf16.mxu1 %v4316_v3 }
 0x483   : > { %3374 = vmatmul.mubr.msk.bf16.vlgmr.msra.gmra.mrb[8].mxu1 %vm1479_vm2, %v1454_v49 }
 0x484   : > { %3378 = vmatpush3.bf16.xpose.msra.mxu1 %v1576_v50  ;;  %3379 = vmatprep.mubr.msk.bf16.mxu1 %vm4318_vm0, %v4316_v3 }
 0x485   : > { %3383 = vmatprep.subr.bf16.mxu1 %v4316_v3 }
 0x48b   : > { %3380 = vmatmul.mubr.msk.bf16.vlgmr.msra.gmra.mrb[12].mxu1 %vm1479_vm2, %v1455_v52 }
 0x48c   : > { %3384 = vmatpush3.bf16.xpose.msra.mxu1 %v1622_v53  ;;  %3385 = vmatprep.mubr.msk.bf16.mxu1 %vm4318_vm0, %v4316_v3 }
 0x48d   : > { %3395 = vmatprep.subr.bf16.mxu1 %v4316_v3 }
 0x493   : > { %3386 = vmatmul.mubr.msk.bf16.vlgmr.msra.gmra.mrb[16].mxu1 %vm1479_vm2, %v1456_v54 }
 0x494   : > { %3397 = vmatprep.mubr.msk.bf16.mxu1 %vm4318_vm0, %v4316_v3 }
 0x54e   : > { %v1520_v63 = vpop.f32.mrb[4].mxu1 }
 0x54f   : > { %v1521_v0 = vadd.f32 %v1520_v63, %v1474_v62  ;;  %v3369_v1 = vpop.f32.mrb[5].mxu1 }
 0x550   : > { %v1523_v2 = vpop.f32.mrb[6].mxu1 }
 0x551   : > { %v3370_v5 = vpop.f32.mrb[7].mxu1  ;;  %v1665_v6 = vsel %vm1664_vm4, %v1521_v0, -inf }
 0x552   : > { %1666 = vmax.xlane.f32.xlu1 %v1665_v6 }
 0x556   : > { %v1566_v7 = vpop.f32.mrb[8].mxu1 }
 0x557   : > { %v1567_v8 = vadd.f32 %v1566_v7, %v1474_v62  ;;  %v3375_v41 = vpop.f32.mrb[9].mxu1 }
 0x558   : > { %v1569_v9 = vpop.f32.mrb[10].mxu1 }
 0x559   : > { %v3376_v11 = vpop.f32.mrb[11].mxu1  ;;  %v1668_v12 = vsel %vm1664_vm4, %v1567_v8, -inf }
 0x55a   : > { %1669 = vmax.xlane.f32.xlu0 %v1668_v12 }
 0x55e   : > { %v1612_v13 = vpop.f32.mrb[12].mxu1 }
 0x55f   : > { %v1613_v14 = vadd.f32 %v1612_v13, %v1474_v62  ;;  %v3381_v15 = vpop.f32.mrb[13].mxu1 }
 0x560   : > { %v1615_v16 = vpop.f32.mrb[14].mxu1 }
 0x561   : > { %v3382_v17 = vpop.f32.mrb[15].mxu1  ;;  %v1671_v18 = vsel %vm1664_vm4, %v1613_v14, -inf }
 0x562   : > { %1672 = vmax.xlane.f32.xlu1 %v1671_v18 }
 0x566   : > { %v1658_v20 = vpop.f32.mrb[16].mxu1 }
 0x567   : > { %v1659_v21 = vadd.f32 %v1658_v20, %v1474_v62  ;;  %v3387_v22 = vpop.f32.mrb[17].mxu1 }
 0x568   : > { %v1661_v23 = vpop.f32.mrb[18].mxu1 }
 0x569   : > { %v3388_v24 = vpop.f32.mrb[19].mxu1  ;;  %v1674_v26 = vsel %vm1664_vm4, %v1659_v21, -inf }
 0x56a   : > { %1675 = vmax.xlane.f32.xlu1 %v1674_v26 }
 0x570   : > { %1140 = vrot.lane.b32.xlu0 %v977_v28, %s4320_s20 }
 0x57b   : > { %1143 = vrot.lane.b32.xlu1 %v977_v28, %s4321_s19 }
 0x57f   : > { %1146 = vrot.lane.b32.xlu1 %v977_v28, %s4319_s16 }
 0x5df   : > { %v1667_v29 = vpop.xlane.xlu1 %1666 }
 0x5e0   : > { %v1677_v30 = vsub.f32 %v1521_v0, %v1667_v29 }
 0x5e2   : > { %v1681_v31 = vmul.f32 1.442695, %v1677_v30 }
 0x5e4   : > { %3758 = vpow2.f32 %v1681_v31 }
 0x5e7   : > { %v1670_v32 = vpop.xlane.xlu0 %1669 }
 0x5e8   : > { %v1678_v33 = vsub.f32 %v1567_v8, %v1670_v32 }
 0x5ea   : > { %v1683_v34 = vmul.f32 1.442695, %v1678_v33 }
 0x5eb   : > { %v1141_v53 = vpop.permute.xlu0 %1140 }
 0x5ec   : > { %3760 = vpow2.f32 %v1683_v34 }
 0x5ee   : > { %v4989_v35 = vpop.eup %3758 }
 0x5ef   : > { %v1673_v44 = vpop.xlane.xlu1 %1672  ;;  %v1689_v48 = vsel %vm1664_vm4, %v4989_v35, 0.0 }
 0x5f0   : > { %v1679_v36 = vsub.f32 %v1613_v14, %v1673_v44  ;;  %1690 = vadd.xlane.f32.xlu0 %v1689_v48 }
 0x5f2   : > { %v1685_v37 = vmul.f32 1.442695, %v1679_v36 }
 0x5f4   : > { %3762 = vpow2.f32 %v1685_v37 }
 0x5f6   : > { %v4993_v38 = vpop.eup %3760 }
 0x5f7   : > { %v1676_v39 = vpop.xlane.xlu1 %1675  ;;  %v1692_v40 = vsel %vm1664_vm4, %v4993_v38, 0.0 }
 0x5f8   : > { %v1680_v46 = vsub.f32 %v1659_v21, %v1676_v39  ;;  %1693 = vadd.xlane.f32.xlu1 %v1692_v40 }
 0x5fa   : > { %v1687_v47 = vmul.f32 1.442695, %v1680_v46 }
 0x5fb   : > { %v1144_v49 = vpop.permute.xlu1 %1143 }
 0x5fc   : > { %3764 = vpow2.f32 %v1687_v47  ;;  %v1149_v51 = vcombine.low %v977_v28, %v1144_v49  ;;  %v1150_v52 = vcombine.high %v977_v28, %v1144_v49 }
 0x5fe   : > { %v4997_v50 = vpop.eup %3762  ;;  %v1157_v58 = vrot.slane %v1149_v51, %v4907_v4  ;;  %v1164_v59 = vrot.slane %v1150_v52, %v4907_v4 }
 0x5ff   : > { %v1147_v54 = vpop.permute.xlu1 %1146  ;;  %v1695_v55 = vsel %vm1664_vm4, %v4997_v50, 0.0 }
 0x600   : > { %v1165_v56 = vcombine.low %v1141_v53, %v1147_v54  ;;  %v1166_v57 = vcombine.high %v1141_v53, %v1147_v54  ;;  %1696 = vadd.xlane.f32.xlu0 %v1695_v55 }
 0x602   : > { %v1173_v60 = vrot.slane %v1165_v56, %v4907_v4  ;;  %v1180_v61 = vrot.slane %v1166_v57, %v4907_v4 }
 0x604   : > { %v1181_v62 = vcombine.low %v1157_v58, %v1173_v60  ;;  %v1182_v63 = vcombine.high %v1157_v58, %v1173_v60  ;;  %v1197_v0 = vcombine.low %v1164_v59, %v1180_v61  ;;  %v1198_v1 = vcombine.high %v1164_v59, %v1180_v61 }
 0x606   : > { %v5005_v2 = vpop.eup %3764  ;;  %v1189_v5 = vrot.slane %v1181_v62, %v4910_v10  ;;  %v1196_v6 = vrot.slane %v1182_v63, %v4910_v10  ;;  %v1205_v7 = vrot.slane %v1197_v0, %v4910_v10  ;;  %v1212_v8 = vrot.slane %v1198_v1, %v4910_v10  ;;  %v3668_v1 = vld [vmem:[#allocation16] sm:$0xff]  }
 0x607   : > { %v1698_v41 = vsel %vm1664_vm4, %v5005_v2, 0.0 }
 0x608   : > { %v1370_v9 = vcombine.low %v1189_v5, %v1196_v6  ;;  %v3175_v11 = vcombine.high %v1189_v5, %v1196_v6  ;;  %v1386_v12 = vcombine.low %v1205_v7, %v1212_v8  ;;  %v3176_v13 = vcombine.high %v1205_v7, %v1212_v8  ;;  %1699 = vadd.xlane.f32.xlu0 %v1698_v41  ;;  %v3669_v5 = vld [vmem:[#allocation16 + $0x8] sm:$0xff]   ;;  %v3671_v6 = vld [vmem:[#allocation16 + $0x18] sm:$0xff]  }
 0x609   : > { %v3673_v7 = vld [vmem:[#allocation16 + $0x28] sm:$0xff]  }
 0x60a   : > { %v1377_v14 = vrot.slane %v1370_v9, %v4907_v4  ;;  %v1385_v15 = vrot.slane %v3175_v11, %v4907_v4  ;;  %v1393_v16 = vrot.slane %v1386_v12, %v4907_v4  ;;  %v1401_v17 = vrot.slane %v3176_v13, %v4907_v4 }
 0x60c   : > { %v1402_v18 = vcombine.low %v1377_v14, %v1385_v15  ;;  %v1403_v20 = vcombine.high %v1377_v14, %v1385_v15  ;;  %v1418_v21 = vcombine.low %v1393_v16, %v1401_v17  ;;  %v1419_v22 = vcombine.high %v1393_v16, %v1401_v17 }
 0x60e   : > { %v1410_v23 = vrot.slane %v1402_v18, %v4910_v10  ;;  %v1417_v24 = vrot.slane %v1403_v20, %v4910_v10  ;;  %v1426_v26 = vrot.slane %v1418_v21, %v4910_v10  ;;  %v1433_v27 = vrot.slane %v1419_v22, %v4910_v10 }
 0x610   : > { %v1434_v28 = vcombine.low %v1410_v23, %v1426_v26  ;;  %v1435_v29 = vcombine.high %v1410_v23, %v1426_v26  ;;  %v1436_v30 = vcombine.low %v1417_v24, %v1433_v27  ;;  %v1437_v31 = vcombine.high %v1417_v24, %v1433_v27 }
 0x612   : > { %v1438_v32 = vpack.c.bf16 %v1434_v28, %v1434_v28  ;;  %v1439_v33 = vpack.c.bf16 %v1435_v29, %v1435_v29  ;;  %v1440_v34 = vpack.c.bf16 %v1436_v30, %v1436_v30  ;;  %v1441_v44 = vpack.c.bf16 %v1437_v31, %v1437_v31 }
 0x614   : > { %1442 = vst.msk [vmem:[#allocation4] sm:$0xf] %vm1289_vm1, %v1438_v32  ;;  %1443 = vst.msk [vmem:[#allocation4 + $0x4] sm:$0xf] %vm1289_vm1, %v1439_v33 }
 0x615   : > { %1444 = vst.msk [vmem:[#allocation4 + $0x8] sm:$0xf] %vm1289_vm1, %v1440_v34  ;;  %1445 = vst.msk [vmem:[#allocation4 + $0xc] sm:$0xf] %vm1289_vm1, %v1441_v44 }
 0x61b   : > { %v1713_v48 = vld [vmem:[#allocation4] sm:$0xf]  ;;  %v1714_v36 = vld [vmem:[#allocation4 + $0x4] sm:$0xf] }
 0x61c   : > { %v1722_v37 = vsel %vm1720_vm5, %v1713_v48, 0  ;;  %v1768_v39 = vsel %vm1720_vm5, %v1714_v36, 0  ;;  %v1715_v51 = vld [vmem:[#allocation4 + $0x8] sm:$0xf]  ;;  %v1716_v57 = vld [vmem:[#allocation4 + $0xc] sm:$0xf] }
 0x61d   : > { %3390 = vmatpush3.bf16.msra.mxu0 %v1722_v37  ;;  %3396 = vmatpush3.bf16.msra.mxu1 %v1768_v39  ;;  %v1814_v54 = vsel %vm1720_vm5, %v1715_v51, 0  ;;  %v1860_v59 = vsel %vm1720_vm5, %v1716_v57, 0  ;;  %v3674_v37 = vld [vmem:[#allocation16 + $0x30] sm:$0xff]  }
 0x61e   : > { %3401 = vmatprep.subr.bf16.mxu0 %v4316_v3  ;;  %3407 = vmatprep.subr.bf16.mxu1 %v4316_v3 }
 0x67d   : > { %v1691_v40 = vpop.xlane.xlu0 %1690 }
 0x67e   : > { %3766 = vrcp.f32 %v1691_v40 }
 0x685   : > { %v1694_v46 = vpop.xlane.xlu1 %1693 }
 0x686   : > { %3768 = vrcp.f32 %v1694_v46 }
 0x688   : > { %v3767_v47 = vpop.eup %3766 }
 0x689   : > { %v1705_v49 = vmul.f32 %v3767_v47, %v4989_v35 }
 0x68b   : > { %v1709_v52 = vpack.c.bf16 %v1705_v49, %v1705_v49 }
 0x68d   : > { %v1697_v53 = vpop.xlane.xlu0 %1696  ;;  %3392 = vmatmul.mubr.msk.bf16.vlgmr.msra.gmra.mrb[4].mxu0 %vm1664_vm4, %v1709_v52 }
 0x68e   : > { %3770 = vrcp.f32 %v1697_v53  ;;  %3402 = vmatpush3.bf16.msra.mxu0 %v1814_v54  ;;  %3403 = vmatprep.mubr.msk.bf16.mxu0 %vm4318_vm0, %v4316_v3  ;;  %v3675_v54 = vld [vmem:[#allocation16 + $0x38] sm:$0xff]  }
 0x68f   : > { %3413 = vmatprep.subr.bf16.mxu0 %v4316_v3 }
 0x690   : > { %v3769_v55 = vpop.eup %3768 }
 0x691   : > { %v1706_v56 = vmul.f32 %v3769_v55, %v4993_v38 }
 0x693   : > { %v1710_v58 = vpack.c.bf16 %v1706_v56, %v1706_v56 }
 0x695   : > { %v1700_v35 = vpop.xlane.xlu0 %1699  ;;  %3398 = vmatmul.mubr.msk.bf16.vlgmr.msra.gmra.mrb[20].mxu1 %vm1664_vm4, %v1710_v58 }
 0x696   : > { %3772 = vrcp.f32 %v1700_v35  ;;  %3408 = vmatpush3.bf16.msra.mxu1 %v1860_v59  ;;  %3409 = vmatprep.mubr.msk.bf16.mxu1 %vm4318_vm0, %v4316_v3 }
 0x698   : > { %v3771_v60 = vpop.eup %3770 }
 0x699   : > { %v1707_v61 = vmul.f32 %v3771_v60, %v4997_v50  ;;  %v3670_v50 = vld [vmem:[#allocation16 + $0x10] sm:$0xff]  }
 0x69b   : > { %v1711_v62 = vpack.c.bf16 %v1707_v61, %v1707_v61 }
 0x69d   : > { %3404 = vmatmul.mubr.msk.bf16.vlgmr.msra.gmra.mrb[8].mxu0 %vm1664_vm4, %v1711_v62 }
 0x69e   : > { %3429 = vmatprep.mubr.msk.bf16.mxu0 %vm4318_vm0, %v4316_v3  ;;  %3414 = vmatpush3.bf16.msra.mxu0 %v3668_v1 }
 0x69f   : > { %3415 = vmatprep.subr.bf16.mxu0 %v4316_v3 }
 0x6a0   : > { %v3773_v38 = vpop.eup %3772 }
 0x6a1   : > { %v1708_v63 = vmul.f32 %v3773_v38, %v5005_v2  ;;  %v3672_v2 = vld [vmem:[#allocation16 + $0x20] sm:$0xff]  }
 0x6a2   : > { %3416 = vmatpush3.bf16.msra.mxu0 %v3669_v5 }
 0x6a3   : > { %v1712_v0 = vpack.c.bf16 %v1708_v63, %v1708_v63  ;;  %3417 = vmatprep.subr.bf16.mxu0 %v4316_v3 }
 0x6a5   : > { %3410 = vmatmul.mubr.msk.bf16.vlgmr.msra.gmra.mrb[24].mxu1 %vm1664_vm4, %v1712_v0 }
 0x6a6   : > { %2444 = vmatprep.mubr.bf16.mxu1 %v4317_v25  ;;  %3418 = vmatpush3.bf16.msra.mxu0 %v3670_v50 }
 0x6a7   : > { %3419 = vmatprep.subr.bf16.mxu0 %v4316_v3 }
 0x6aa   : > { %3420 = vmatpush3.bf16.msra.mxu0 %v3671_v6 }
 0x6ab   : > { %3421 = vmatprep.subr.bf16.mxu0 %v4316_v3 }
 0x6ae   : > { %3422 = vmatpush3.bf16.msra.mxu0 %v3672_v2 }
 0x6af   : > { %3423 = vmatprep.subr.bf16.mxu0 %v4316_v3 }
 0x6b2   : > { %3424 = vmatpush3.bf16.msra.mxu0 %v3673_v7 }
 0x6b3   : > { %3425 = vmatprep.subr.bf16.mxu0 %v4316_v3 }
 0x6b6   : > { %3426 = vmatpush3.bf16.msra.mxu0 %v3674_v37  ;;  %v3697_v37 = vld [vmem:[#allocation22 + $0x68] ss:$16 sps:$4 sm:$0xff]  }
 0x6b7   : > { %3427 = vmatprep.subr.bf16.mxu0 %v4316_v3 }
 0x6ba   : > { %3428 = vmatpush3.bf16.msra.mxu0 %v3675_v54  ;;  %v3714_v54 = vld [vmem:[#allocation22 + $0xc4] ss:$16 sps:$4 sm:$0xff]  }
 0x760   : > { %v1758_v8 = vpop.f32.mrb[4].mxu0 }
 0x761   : > { %v3393_v41 = vpop.f32.mrb[5].mxu0 }
 0x762   : > { %v1761_v9 = vpop.f32.mrb[6].mxu0 }
 0x763   : > { %v3394_v11 = vpop.f32.mrb[7].mxu0  ;;  %v1448_v9 = vld [vmem:[%s4826_s14] sm:$0xff] }
 0x768   : > { %v1804_v12 = vpop.f32.mrb[20].mxu1 }
 0x769   : > { %v3399_v13 = vpop.f32.mrb[21].mxu1 }
 0x76a   : > { %v1807_v14 = vpop.f32.mrb[22].mxu1 }
 0x76b   : > { %v3400_v15 = vpop.f32.mrb[23].mxu1 }
 0x770   : > { %v1850_v16 = vpop.f32.mrb[8].mxu0 }
 0x771   : > { %v1902_v17 = vcombine.low %v1758_v8, %v1850_v16  ;;  %v1903_v18 = vcombine.high %v1758_v8, %v1850_v16  ;;  %v3405_v20 = vpop.f32.mrb[9].mxu0 }
 0x772   : > { %v1853_v21 = vpop.f32.mrb[10].mxu0  ;;  %v3678_v20 = vld [vmem:[#allocation22 + $0x4] ss:$16 sps:$4 sm:$0xff]  }
 0x773   : > { %v3406_v22 = vpop.f32.mrb[11].mxu0  ;;  %v1910_v29 = vrot.slane %v1902_v17, %v4907_v4  ;;  %v1917_v30 = vrot.slane %v1903_v18, %v4907_v4  ;;  %v3676_v18 = vld [vmem:[#allocation22] ss:$16 sps:$4 sm:$0xff]   ;;  %v3679_v21 = vld [vmem:[#allocation22 + $0x8] ss:$16 sps:$4 sm:$0xff]   ;;  %2412 = vmatprep.subr.bf16.mxu1 %v3678_v20 }
 0x774   : > { %v3681_v22 = vld [vmem:[#allocation22 + $0xc] ss:$16 sps:$4 sm:$0xff]   ;;  %2413 = vmatpush1.bf16.msra.mxu1 %v3676_v18 }
 0x775   : > { %2453 = vmatprep.subr.bf16.mxu0 %v3681_v22  ;;  %v3737_v18 = vld [vmem:[#allocation25 + $0xd8] sm:$0xff]   ;;  %v3740_v22 = vld [vmem:[#allocation25 + $0x60] sm:$0xff]  }
 0x776   : > { %v3738_v20 = vld [vmem:[#allocation25 + $0x18] sm:$0xff]  }
 0x778   : > { %v1896_v23 = vpop.f32.mrb[24].mxu1 }
 0x779   : > { %v1918_v24 = vcombine.low %v1804_v12, %v1896_v23  ;;  %v1919_v26 = vcombine.high %v1804_v12, %v1896_v23  ;;  %v3411_v27 = vpop.f32.mrb[25].mxu1  ;;  %v3195_v12 = vld [vmem:[#allocation17] ss:$0 sm:$0xff]  ;;  %v3684_v23 = vld [vmem:[#allocation22 + $0x24] ss:$16 sps:$4 sm:$0xff]  }
 0x77a   : > { %v1899_v28 = vpop.f32.mrb[26].mxu1  ;;  %2414 = vmatprep.subr.bf16.mxu1 %v3684_v23  ;;  %v3690_v27 = vld [vmem:[#allocation22 + $0x44] ss:$16 sps:$4 sm:$0xff]  }
 0x77b   : > { %v1926_v31 = vrot.slane %v1918_v24, %v4907_v4  ;;  %v1933_v32 = vrot.slane %v1919_v26, %v4907_v4  ;;  %v3412_v33 = vpop.f32.mrb[27].mxu1  ;;  %v3687_v24 = vld [vmem:[#allocation22 + $0x2c] ss:$16 sps:$4 sm:$0xff]   ;;  %v3685_v26 = vld [vmem:[#allocation22 + $0x28] ss:$16 sps:$4 sm:$0xff]  }
 0x77c   : > { %v3693_v28 = vld [vmem:[#allocation22 + $0x4c] ss:$16 sps:$4 sm:$0xff]   ;;  %v3741_v23 = vld [vmem:[#allocation25 + $0xe0] sm:$0xff]  }
 0x77d   : > { %v1934_v34 = vcombine.low %v1910_v29, %v1926_v31  ;;  %v1935_v44 = vcombine.high %v1910_v29, %v1926_v31  ;;  %v1950_v48 = vcombine.low %v1917_v30, %v1933_v32  ;;  %v1951_v36 = vcombine.high %v1917_v30, %v1933_v32  ;;  %v3688_v29 = vld [vmem:[#allocation22 + $0x40] ss:$16 sps:$4 sm:$0xff]   ;;  %v3691_v30 = vld [vmem:[#allocation22 + $0x48] ss:$16 sps:$4 sm:$0xff]  }
 0x77f   : > { %v1942_v39 = vrot.slane %v1934_v34, %v4910_v10  ;;  %v1949_v40 = vrot.slane %v1935_v44, %v4910_v10  ;;  %v1958_v46 = vrot.slane %v1950_v48, %v4910_v10  ;;  %v1965_v47 = vrot.slane %v1951_v36, %v4910_v10  ;;  %v3696_v44 = vld [vmem:[#allocation22 + $0x64] ss:$16 sps:$4 sm:$0xff]   ;;  %v3699_v48 = vld [vmem:[#allocation22 + $0x6c] ss:$16 sps:$4 sm:$0xff]   ;;  %v3694_v36 = vld [vmem:[#allocation22 + $0x60] ss:$16 sps:$4 sm:$0xff]  }
 0x781   : > { %v1970_v49 = vcombine.low %v1942_v39, %v1949_v40  ;;  %v3185_v51 = vcombine.high %v1942_v39, %v1949_v40  ;;  %v1986_v52 = vcombine.low %v1958_v46, %v1965_v47  ;;  %v3186_v53 = vcombine.high %v1958_v46, %v1965_v47  ;;  %v3702_v39 = vld [vmem:[#allocation22 + $0x84] ss:$16 sps:$4 sm:$0xff]   ;;  %v3705_v40 = vld [vmem:[#allocation22 + $0x8c] ss:$16 sps:$4 sm:$0xff]   ;;  %v3700_v46 = vld [vmem:[#allocation22 + $0x80] ss:$16 sps:$4 sm:$0xff]  }
 0x782   : > { %v3703_v47 = vld [vmem:[#allocation22 + $0x88] ss:$16 sps:$4 sm:$0xff]  }
 0x783   : > { %v1977_v55 = vrot.slane %v1970_v49, %v4907_v4  ;;  %v1985_v56 = vrot.slane %v3185_v51, %v4907_v4  ;;  %v1993_v57 = vrot.slane %v1986_v52, %v4907_v4  ;;  %v2001_v58 = vrot.slane %v3186_v53, %v4907_v4  ;;  %v3708_v49 = vld [vmem:[#allocation22 + $0xa4] ss:$16 sps:$4 sm:$0xff]   ;;  %v3711_v51 = vld [vmem:[#allocation22 + $0xac] ss:$16 sps:$4 sm:$0xff]   ;;  %v3706_v52 = vld [vmem:[#allocation22 + $0xa0] ss:$16 sps:$4 sm:$0xff]  }
 0x784   : > { %v3709_v53 = vld [vmem:[#allocation22 + $0xa8] ss:$16 sps:$4 sm:$0xff]  }
 0x785   : > { %v2003_v35 = vcombine.high %v1977_v55, %v1985_v56  ;;  %v2019_v59 = vcombine.high %v1993_v57, %v2001_v58  ;;  %v2002_v60 = vcombine.low %v1977_v55, %v1985_v56  ;;  %v2018_v61 = vcombine.low %v1993_v57, %v2001_v58  ;;  %v3717_v55 = vld [vmem:[#allocation22 + $0xcc] ss:$16 sps:$4 sm:$0xff]   ;;  %v3712_v56 = vld [vmem:[#allocation22 + $0xc0] ss:$16 sps:$4 sm:$0xff]   ;;  %v3715_v57 = vld [vmem:[#allocation22 + $0xc8] ss:$16 sps:$4 sm:$0xff]  }
 0x786   : > { %v3720_v58 = vld [vmem:[#allocation22 + $0xe4] ss:$16 sps:$4 sm:$0xff]  }
 0x787   : > { %v2017_v3 = vrot.slane %v2003_v35, %v4910_v10  ;;  %v2033_v62 = vrot.slane %v2019_v59, %v4910_v10  ;;  %v2010_v38 = vrot.slane %v2002_v60, %v4910_v10  ;;  %v2026_v63 = vrot.slane %v2018_v61, %v4910_v10  ;;  %v3723_v35 = vld [vmem:[#allocation22 + $0xec] ss:$16 sps:$4 sm:$0xff]   ;;  %v3718_v59 = vld [vmem:[#allocation22 + $0xe0] ss:$16 sps:$4 sm:$0xff]   ;;  %v3721_v60 = vld [vmem:[#allocation22 + $0xe8] ss:$16 sps:$4 sm:$0xff]  }
 0x789   : > { %v2036_v0 = vcombine.low %v2017_v3, %v2033_v62  ;;  %v2035_v1 = vcombine.high %v2010_v38, %v2026_v63  ;;  %v2037_v5 = vcombine.high %v2017_v3, %v2033_v62  ;;  %v2034_v50 = vcombine.low %v2010_v38, %v2026_v63  ;;  %v3196_v63 = vld [vmem:[#allocation19] ss:$0 sm:$0xff] }
 0x78b   : > { %2043 = vrot.lane.b32.xlu0 %v2036_v0, %s4321_s19  ;;  %2039 = vrot.lane.b32.xlu1 %v2035_v1, %s4319_s16  ;;  %v3197_v1 = vld [vmem:[#allocation20] ss:$0 sm:$0xff]  ;;  %s4184_s16 = sshll.u32 %s4325_s23, 4  ;;  %s4185_s16 = int_to_ptr.vmem [resolvable:$false] %s4184_s16 }
 0x78c   : > { %p4187_p9 = scmp.lt.s32.totalorder %s5095_s8, %s4185_s16 }
 0x78f   : > { %2047 = vrot.lane.b32.xlu1 %v2037_v5, %s4320_s20  ;;  %s4186_s20 = scalar_lea.vmem %s4185_s16, 256 }
 0x790   : > { %p4188_p4 = scmp.lt.s32.totalorder %s4186_s20, %s4180_s1 }
 0x792   : > { %p4189_p6 = por %p4188_p4, %p4187_p9 }
 0x794   : > { %p4190_p3 = pnand %p4189_p6, %p4183_p8 }
 0x7fd   : > { %v2040_v4 = vpop.permute.xlu1 %2039  ;;  %v2044_v6 = vpop.permute.xlu0 %2043 }
 0x7fe   : > { %v2050_v2 = vsel %vm1479_vm2, %v2034_v50, %v2040_v4 }
 0x7ff   : > { %v2052_v8 = vsel %vm2051_vm6, %v2050_v2, %v2044_v6  ;;  %v3724_v6 = vld [vmem:[#allocation25 + $0x40] sm:$0xff]  }
 0x800   : > { %v3725_v2 = vld [vmem:[#allocation25 + $0xc0] sm:$0xff]  }
 0x801   : > { %v2048_v7 = vpop.permute.xlu1 %2047 }
 0x802   : > { %v2054_v10 = vsel %vm2053_vm7, %v2052_v8, %v2048_v7  ;;  %v3726_v7 = vld [vmem:[#allocation25] sm:$0xff]  }
 0x803   : > { %v2055_v41 = vpack.c.bf16 %v2054_v10, %v2054_v10  ;;  %v3727_v8 = vld [vmem:[#allocation25 + $0x80] sm:$0xff]   ;;  %v3728_v10 = vld [vmem:[#allocation25 + $0x48] sm:$0xff]  }
 0x805   : > { %3430 = vmatmul.mubr.bf16.vlgmr.msra.gmra.mrb[12].mxu0 %v2055_v41  ;;  %v3729_v41 = vld [vmem:[#allocation25 + $0xc8] sm:$0xff]  }
 0x806   : > { %2485 = vmatprep.mubr.bf16.mxu0 %v4317_v25  ;;  %v3682_v25 = vld [vmem:[#allocation22 + $0x20] ss:$16 sps:$4 sm:$0xff]   ;;  %2454 = vmatpush1.bf16.msra.mxu0 %v3679_v21 }
 0x807   : > { %2455 = vmatprep.subr.bf16.mxu0 %v3687_v24  ;;  %2415 = vmatpush1.bf16.msra.mxu1 %v3682_v25  ;;  %v3739_v21 = vld [vmem:[#allocation25 + $0x98] sm:$0xff]   ;;  %v3742_v24 = vld [vmem:[#allocation25 + $0x20] sm:$0xff]  }
 0x808   : > { %2416 = vmatprep.subr.bf16.mxu1 %v3690_v27  ;;  %v3743_v25 = vld [vmem:[#allocation25 + $0xa0] sm:$0xff]   ;;  %v3745_v27 = vld [vmem:[#allocation25 + $0xe8] sm:$0xff]  }
 0x80a   : > { %2456 = vmatpush1.bf16.msra.mxu0 %v3685_v26  ;;  %v3744_v26 = vld [vmem:[#allocation25 + $0x68] sm:$0xff]  }
 0x80b   : > { %2457 = vmatprep.subr.bf16.mxu0 %v3693_v28  ;;  %2417 = vmatpush1.bf16.msra.mxu1 %v3688_v29  ;;  %v3746_v28 = vld [vmem:[#allocation25 + $0x28] sm:$0xff]  }
 0x80c   : > { %2418 = vmatprep.subr.bf16.mxu1 %v3696_v44  ;;  %v3747_v29 = vld [vmem:[#allocation25 + $0xa8] sm:$0xff]   ;;  %v3753_v44 = vld [vmem:[#allocation25 + $0xf8] sm:$0xff]  }
 0x80e   : > { %2458 = vmatpush1.bf16.msra.mxu0 %v3691_v30  ;;  %v3748_v30 = vld [vmem:[#allocation25 + $0x70] sm:$0xff]  }
 0x80f   : > { %2459 = vmatprep.subr.bf16.mxu0 %v3699_v48  ;;  %2419 = vmatpush1.bf16.msra.mxu1 %v3694_v36  ;;  %v3754_v48 = vld [vmem:[#allocation25 + $0x38] sm:$0xff]  }
 0x810   : > { %2420 = vmatprep.subr.bf16.mxu1 %v3702_v39  ;;  %v3755_v36 = vld [vmem:[#allocation25 + $0xb8] sm:$0xff]   ;;  %v2246_v39 = vsub.s32 3, %v4885_v42 }
 0x812   : > { %2460 = vmatpush1.bf16.msra.mxu0 %v3697_v37  ;;  %v2230_v37 = vld [vmem:[#allocation23] sm:$0xf] }
 0x813   : > { %2461 = vmatprep.subr.bf16.mxu0 %v3705_v40  ;;  %2421 = vmatpush1.bf16.msra.mxu1 %v3700_v46  ;;  %v2235_v40 = vrot.slane %v2230_v37, %v4891_v45  ;;  %v2243_v46 = vrot.slane %v2230_v37, %v768_v19 }
 0x814   : > { %2422 = vmatprep.subr.bf16.mxu1 %v3708_v49  ;;  %v2247_v49 = vrot.slane %v2230_v37, %v2246_v39 }
 0x816   : > { %2462 = vmatpush1.bf16.msra.mxu0 %v3703_v47  ;;  %v2239_v47 = vrot.slane %v2230_v37, %v764_v43 }
 0x817   : > { %2463 = vmatprep.subr.bf16.mxu0 %v3711_v51  ;;  %2423 = vmatpush1.bf16.msra.mxu1 %v3706_v52 }
 0x818   : > { %2424 = vmatprep.subr.bf16.mxu1 %v3714_v54 }
 0x81a   : > { %2464 = vmatpush1.bf16.msra.mxu0 %v3709_v53 }
 0x81b   : > { %2465 = vmatprep.subr.bf16.mxu0 %v3717_v55  ;;  %2425 = vmatpush1.bf16.msra.mxu1 %v3712_v56 }
 0x81c   : > { %2426 = vmatprep.subr.bf16.mxu1 %v3720_v58 }
 0x81e   : > { %2466 = vmatpush1.bf16.msra.mxu0 %v3715_v57 }
 0x81f   : > { %2467 = vmatprep.subr.bf16.mxu0 %v3723_v35  ;;  %2427 = vmatpush1.bf16.msra.mxu1 %v3718_v59 }
 0x820   : > { %3301 = vmatprep.subr.bf16.mxu1 %v3724_v6 }
 0x822   : > { %2468 = vmatpush1.bf16.msra.mxu0 %v3721_v60 }
 0x823   : > { %3323 = vmatprep.subr.bf16.mxu0 %v3725_v2 }
 0x8d8   : > { %v2154_v11 = vpop.f32.mrb[12].mxu0 }
 0x8d9   : > { %v2160_v13 = vadd.f32 %v2154_v11, %v1448_v9  ;;  %v3431_v14 = vpop.f32.mrb[13].mxu0  ;;  %v3730_v9 = vld [vmem:[#allocation25 + $0x8] sm:$0xff]  }
 0x8da   : > { %v2157_v15 = vpop.f32.mrb[14].mxu0  ;;  %v3731_v11 = vld [vmem:[#allocation25 + $0x88] sm:$0xff]   ;;  %v3734_v14 = vld [vmem:[#allocation25 + $0x10] sm:$0xff]  }
 0x8db   : > { %v5076_v16 = vadd.f32 %v3195_v12, %v2160_v13  ;;  %v3432_v17 = vpop.f32.mrb[15].mxu0  ;;  %v3732_v12 = vld [vmem:[#allocation25 + $0x50] sm:$0xff]  }
 0x8dc   : > { %v3733_v13 = vld [vmem:[#allocation25 + $0xd0] sm:$0xff]   ;;  %v3736_v17 = vld [vmem:[#allocation25 + $0x58] sm:$0xff]  }
 0x8dd   : > { %2171 = vadd.xlane.f32.xlu1 %v5076_v16  ;;  %v3735_v15 = vld [vmem:[#allocation25 + $0x90] sm:$0xff]  }
 0x96a   : > { %v2172_v31 = vpop.xlane.xlu1 %2171 }
 0x96b   : > { %v2174_v32 = vmul.f32 0.0078125, %v2172_v31  ;;  %v3749_v31 = vld [vmem:[#allocation25 + $0xf0] sm:$0xff]  }
 0x96d   : > { %v2175_v33 = vsub.f32 %v5076_v16, %v2174_v32  ;;  %v3750_v32 = vld [vmem:[#allocation25 + $0x30] sm:$0xff]  }
 0x96f   : > { %v2176_v34 = vmul.f32 %v2175_v33, %v2175_v33 }
 0x971   : > { %2177 = vadd.xlane.f32.xlu0 %v2176_v34  ;;  %v3752_v34 = vld [vmem:[#allocation25 + $0x78] sm:$0xff]  }
 0x9fe   : > { %v2178_v61 = vpop.xlane.xlu0 %2177 }
 0x9ff   : > { %v2179_v3 = vmul.f32 0.0078125, %v2178_v61 }
 0xa01   : > { %v2180_v62 = vadd.f32 1e-05, %v2179_v3 }
 0xa03   : > { %3774 = vrsqrt.f32 %v2180_v62 }
 0xa0d   : > { %v3775_v38 = vpop.eup %3774 }
 0xa0e   : > { %v2182_v0 = vmul.f32 %v3775_v38, %v2175_v33  ;;  %v3751_v33 = vld [vmem:[#allocation25 + $0xb0] sm:$0xff]  }
 0xa10   : > { %v2189_v5 = vmul.f32 %v3196_v63, %v2182_v0 }
 0xa12   : > { %v2196_v50 = vadd.f32 %v3197_v1, %v2189_v5 }
 0xa14   : > { %v2197_v4 = vpack.c.bf16 %v2196_v50, %v2196_v50 }
 0xa16   : > { %2445 = vmatmul.mubr.bf16.vlgmr.msra.gmra.mrb[28].mxu1 %v2197_v4  ;;  %2486 = vmatmul.mubr.bf16.vlgmr.msra.gmra.mrb[16].mxu0 %v2197_v4 }
 0xa17   : > { %3302 = vmatpush3.bf16.msra.mxu1 %v3726_v7  ;;  %3324 = vmatpush3.bf16.msra.mxu0 %v3727_v8 }
 0xa18   : > { %3303 = vmatprep.subr.bf16.mxu1 %v3728_v10  ;;  %3325 = vmatprep.subr.bf16.mxu0 %v3729_v41 }
 0xa1b   : > { %3304 = vmatpush3.bf16.msra.mxu1 %v3730_v9  ;;  %3326 = vmatpush3.bf16.msra.mxu0 %v3731_v11 }
 0xa1c   : > { %3305 = vmatprep.subr.bf16.mxu1 %v3732_v12  ;;  %3327 = vmatprep.subr.bf16.mxu0 %v3733_v13 }
 0xa1f   : > { %3306 = vmatpush3.bf16.msra.mxu1 %v3734_v14  ;;  %3328 = vmatpush3.bf16.msra.mxu0 %v3735_v15 }
 0xa20   : > { %3307 = vmatprep.subr.bf16.mxu1 %v3736_v17  ;;  %3329 = vmatprep.subr.bf16.mxu0 %v3737_v18 }
 0xa23   : > { %3308 = vmatpush3.bf16.msra.mxu1 %v3738_v20  ;;  %3330 = vmatpush3.bf16.msra.mxu0 %v3739_v21 }
 0xa24   : > { %3309 = vmatprep.subr.bf16.mxu1 %v3740_v22  ;;  %3331 = vmatprep.subr.bf16.mxu0 %v3741_v23 }
 0xa27   : > { %3310 = vmatpush3.bf16.msra.mxu1 %v3742_v24  ;;  %3332 = vmatpush3.bf16.msra.mxu0 %v3743_v25 }
 0xa28   : > { %3311 = vmatprep.subr.bf16.mxu1 %v3744_v26  ;;  %3333 = vmatprep.subr.bf16.mxu0 %v3745_v27 }
 0xa2b   : > { %3312 = vmatpush3.bf16.msra.mxu1 %v3746_v28  ;;  %3334 = vmatpush3.bf16.msra.mxu0 %v3747_v29 }
 0xa2c   : > { %3313 = vmatprep.subr.bf16.mxu1 %v3748_v30  ;;  %3335 = vmatprep.subr.bf16.mxu0 %v3749_v31 }
 0xa2f   : > { %3314 = vmatpush3.bf16.msra.mxu1 %v3750_v32  ;;  %3336 = vmatpush3.bf16.msra.mxu0 %v3751_v33 }
 0xa30   : > { %3315 = vmatprep.subr.bf16.mxu1 %v3752_v34  ;;  %3337 = vmatprep.subr.bf16.mxu0 %v3753_v44  ;;  %v3230_v44 = vld [vmem:[#allocation26] ss:$0 sm:$0xff] }
 0xa33   : > { %3316 = vmatpush3.bf16.msra.mxu1 %v3754_v48  ;;  %3338 = vmatpush3.bf16.msra.mxu0 %v3755_v36 }
 0xae9   : > { %v2446_v51 = vpop.f32.mrb[28].mxu1  ;;  %v2487_v52 = vpop.f32.mrb[16].mxu0 }
 0xaea   : > { %v2447_v53 = vadd.f32 %v2446_v51, %v2235_v40  ;;  %v2488_v54 = vadd.f32 %v2487_v52, %v2243_v46  ;;  %v2448_v55 = vpop.f32.mrb[29].mxu1  ;;  %v2489_v56 = vpop.f32.mrb[17].mxu0 }
 0xaeb   : > { %v2449_v57 = vadd.f32 %v2448_v55, %v2239_v47  ;;  %v2490_v58 = vadd.f32 %v2489_v56, %v2247_v49  ;;  %v2450_v35 = vpop.f32.mrb[30].mxu1  ;;  %v2491_v59 = vpop.f32.mrb[18].mxu0 }
 0xaec   : > { %v2494_v60 = vmul.f32 %v2447_v53, %v2447_v53  ;;  %v2496_v61 = vmul.f32 %v2488_v54, %v2488_v54  ;;  %v2451_v45 = vpop.f32.mrb[31].mxu1  ;;  %v2492_v3 = vpop.f32.mrb[19].mxu0 }
 0xaed   : > { %v2495_v62 = vmul.f32 %v2449_v57, %v2449_v57  ;;  %v2497_v19 = vmul.f32 %v2490_v58, %v2490_v58 }
 0xaee   : > { %v2498_v38 = vmul.f32 %v2494_v60, %v2447_v53  ;;  %v2500_v42 = vmul.f32 %v2496_v61, %v2488_v54 }
 0xaef   : > { %v2499_v43 = vmul.f32 %v2495_v62, %v2449_v57  ;;  %v2501_v63 = vmul.f32 %v2497_v19, %v2490_v58 }
 0xaf0   : > { %v2502_v0 = vmul.f32 0.044715, %v2498_v38  ;;  %v2504_v1 = vmul.f32 0.044715, %v2500_v42 }
 0xaf1   : > { %v2503_v5 = vmul.f32 0.044715, %v2499_v43  ;;  %v2505_v50 = vmul.f32 0.044715, %v2501_v63 }
 0xaf2   : > { %v2506_v4 = vadd.f32 %v2502_v0, %v2447_v53  ;;  %v2508_v6 = vadd.f32 %v2504_v1, %v2488_v54 }
 0xaf3   : > { %v2507_v2 = vadd.f32 %v2503_v5, %v2449_v57  ;;  %v2509_v7 = vadd.f32 %v2505_v50, %v2490_v58 }
 0xaf4   : > { %v2510_v8 = vmul.f32 0.7978846, %v2506_v4  ;;  %v2512_v10 = vmul.f32 0.7978846, %v2508_v6 }
 0xaf5   : > { %v2511_v41 = vmul.f32 0.7978846, %v2507_v2  ;;  %v2513_v9 = vmul.f32 0.7978846, %v2509_v7 }
 0xaf6   : > { %3776 = vtanh.f32 %v2510_v8 }
 0xaf7   : > { %3778 = vtanh.f32 %v2512_v10 }
 0xaf8   : > { %3780 = vtanh.f32 %v2511_v41 }
 0xaf9   : > { %3782 = vtanh.f32 %v2513_v9 }
 0xb00   : > { %v3777_v11 = vpop.eup %3776 }
 0xb01   : > { %v3779_v12 = vpop.eup %3778  ;;  %v2518_v13 = vadd.f32 1.0, %v3777_v11 }
 0xb02   : > { %v3781_v14 = vpop.eup %3780  ;;  %v2520_v15 = vadd.f32 1.0, %v3779_v12 }
 0xb03   : > { %v3783_v17 = vpop.eup %3782  ;;  %v2519_v18 = vadd.f32 1.0, %v3781_v14  ;;  %v2522_v20 = vmul.f32 0.5, %v2518_v13 }
 0xb04   : > { %v2521_v21 = vadd.f32 1.0, %v3783_v17  ;;  %v2524_v22 = vmul.f32 0.5, %v2520_v15 }
 0xb05   : > { %v2523_v23 = vmul.f32 0.5, %v2519_v18  ;;  %v2526_v25 = vmul.f32 %v2522_v20, %v2447_v53 }
 0xb06   : > { %v2525_v24 = vmul.f32 0.5, %v2521_v21  ;;  %v2528_v27 = vmul.f32 %v2524_v22, %v2488_v54 }
 0xb07   : > { %v2527_v26 = vmul.f32 %v2523_v23, %v2449_v57  ;;  %v2530_v31 = vpack.c.bf16 %v2526_v25, %v2526_v25 }
 0xb08   : > { %v2529_v28 = vmul.f32 %v2525_v24, %v2490_v58  ;;  %v2532_v32 = vpack.c.bf16 %v2528_v27, %v2528_v27 }
 0xb09   : > { %v2531_v29 = vpack.c.bf16 %v2527_v26, %v2527_v26 }
 0xb0a   : > { %v2533_v30 = vpack.c.bf16 %v2529_v28, %v2529_v28 }
 0xb0b   : > { %2829 = vmatprep.mubr.bf16.mxu1 %v2531_v29 }
 0xb0c   : > { %2869 = vmatprep.mubr.bf16.mxu0 %v2533_v30  ;;  %2830 = vmatmul.mubr.bf16.vlgmr.msra.gmra.mrb[32].mxu1 %v2530_v31 }
 0xb0d   : > { %2870 = vmatmul.mubr.bf16.vlgmr.msra.gmra.mrb[20].mxu0 %v2532_v32 }
 0xbdf   : > { %v3317_v33 = vpop.f32.mrb[32].mxu1 }
 0xbe0   : > { %v3339_v34 = vpop.f32.mrb[20].mxu0  ;;  %v3318_v48 = vpop.f32.mrb[33].mxu1 }
 0xbe1   : > { %v3319_v36 = vadd.f32 %v3318_v48, %v3317_v33  ;;  %v3340_v37 = vpop.f32.mrb[21].mxu0  ;;  %v3320_v39 = vpop.f32.mrb[34].mxu1 }
 0xbe2   : > { %v3341_v40 = vadd.f32 %v3340_v37, %v3339_v34  ;;  %v3342_v46 = vpop.f32.mrb[22].mxu0  ;;  %v3321_v47 = vpop.f32.mrb[35].mxu1 }
 0xbe3   : > { %v2832_v49 = vadd.f32 %v3319_v36, %v3230_v44  ;;  %v3343_v51 = vpop.f32.mrb[23].mxu0 }
 0xbe5   : > { %v2872_v52 = vadd.f32 %v3341_v40, %v2832_v49 }
 0xbe7   : > { %v2877_v53 = vadd.f32 %v2872_v52, %v5076_v16 }
 0xbe9   : > { %2878 = vst [vmem:[%s688_s2] sm:$0xff] %v2877_v53 }
 0xbea   : > { %4193 = shalt.err (!%p4190_p3)
}
 0xbeb   : > { %s4194_s5 = scalar_lea.hbm %s5093_s7, 128  ;;  %s4198_s4 = scalar_lea.hbm %s5224_s6, 256 }
 0xbec   : > { %p4195_p12 = scmp.ne.s32.totalorder %s5093_s7, %s4194_s5  ;;  %p4199_p13 = scmp.lt.u32.totalorder %s5093_s7, %s5224_s6 }
 0xbed   : > { %p4200_p1 = scmp.lt.u32.totalorder %s4198_s4, %s4194_s5  ;;  %p4202_p5 = scmp.lt.u32.totalorder %s4194_s5, %s5093_s7 }
 0xbee   : > { %p4196_p0 = pnand %p4195_p12, %p5225_p7 }
 0xbef   : > { %p4201_p11 = por %p4200_p1, %p4199_p13 }
 0xbf0   : > { %p4197_p10 = pneg %p4196_p0 }
 0xbf1   : > { %p4203_p2 = por %p4202_p5, %p4201_p11 }
 0xbf3   : > { %p4204_p8 = pnand %p4203_p2, %p4197_p10 }
 0xbf5   : > { %4207 = shalt.err (!%p4204_p8)
}
 0xbf6   : > { %3485 = dma.vmem_to_hbm [thread:$0]  (%p5225_p7), %s5095_s8, 128, %s5093_s7, %s2880_s3  }
 0xbf7 PF: > { %s2906_s14 = sand.u32 1, %s4274_s29   ;;  %p5226_p9 = scmp.ne.s32.totalorder %s5200_s28, 0 }
 0xbf8   : > { %p5227_p4 = scmp.ge.s32.totalorder %s4294_s18, 2  ;;  %s2907_s1 = scalar_lea.sflag [#allocation7], %s2906_s14 }
 0xbfa   : > { %p3532_p6 = pnand %p5227_p4, %p5226_p9 }
 0xbfc   : > { %4269 = dma.done.wait (!%p3532_p6), %s2907_s1, 128  }
 0xbfd   : > { %4271 = vsyncadd (!%p3532_p6), %s2907_s1, 4294967168  ;;  %s39_s18 = sadd.s32 1, %s4294_s18   ;;  %s5228_s29 = smov %s4278_s30 }
 0xbfe   : > { %p36_p3 = scmp.ge.s32.totalorder %s39_s18, 4   ;;  %s5229_s30 = smov %s4282_s15 }
 0xbff   : > { %s5230_s15 = smov %s4737_s21  ;;  %s5231_s16 = smov %s4290_s17 }
 0xc00   : > { %s5232_s17 = smov %s5234_s27  ;;  %38 = sbr.rel (!%p36_p3) target bundleno = 25 (0x19), region = 188 }
 0xc07   :  { %2912 = vsyncpa [#allocation6], 1 }
 0xc08   :  { %2914 = vsyncpa [#allocation6 + $0x1], 1 }
 0xc09   :  { %2915 = vsyncpa [#allocation9], 1 }
 0xc0a   :  { %2917 = vsyncpa [#allocation9 + $0x1], 1 }
 0xc0b   :  { %2918 = vsyncpa [#allocation12], 1 }
 0xc0c   :  { %2919 = vsyncpa [#allocation15], 1 }
 0xc0d   :  { %2920 = vsyncpa [#allocation18], 1 }
 0xc0e   :  { %2921 = vsyncpa [#allocation21], 1 }
 0xc0f   :  { %2922 = vsyncpa [#allocation24], 1 }
 0xc10   :  { %2923 = vsyncpa [#allocation27], 1 }
 0xc11   :  { %2924 = vsyncpa [#allocation7], 1 }
 0xc12   :  { %2926 = vsyncpa [#allocation7 + $0x1], 1 }

</bundles_post_ra>
